<compile_context>
chip_gen: v6e
topology: v6e:2x2x1
jax: 0.10.0
libtpu: 0.0.40
codegen_flags: <defaults>
</compile_context>

<pallas_src>
import math
import jax
import jax.numpy as jnp
from jax import lax
from jax.experimental import pallas as pl
from jax.experimental.pallas import tpu as pltpu
import numpy as np


# ------------------------------ Pallas kernel ------------------------------ #
def _matmul_bias_relu_kernel(x_ref, w_ref, b_ref, o_ref):
    """x_ref: (bm, K) bf16 im2col tile; w_ref: (K, Cout) bf16 (BN scale folded);
    b_ref: (1, Cout) f32 folded bias; o_ref: (bm, Cout)."""
    acc = jnp.dot(x_ref[...], w_ref[...], preferred_element_type=jnp.float32)
    o_ref[...] = jnp.maximum(acc + b_ref[...], 0.0).astype(o_ref.dtype)


def matmul_bias_relu(x2d, w2d, bias, out_dtype=jnp.float32):
    """(M, K) @ (K, Cout) + bias, ReLU.  Row-tiled over M, operands in bf16."""
    M, K = x2d.shape
    Kw, Cout = w2d.shape
    assert K == Kw

    # Large row tiles amortize per-grid-step overhead; keep >= 2 steps so the
    # "parallel" grid axis can shard across v7x's two TensorCores.  VMEM per
    # tile (bf16 input + resident weights + f32 out) stays well under 2 MiB.
    bm = 512 if M >= 1024 else 256
    Mp = ((M + bm - 1) // bm) * bm
    if Mp != M:
        x2d = jnp.pad(x2d, ((0, Mp - M), (0, 0)))

    out = pl.pallas_call(
        _matmul_bias_relu_kernel,
        out_shape=jax.ShapeDtypeStruct((Mp, Cout), out_dtype),
        grid=(Mp // bm,),
        in_specs=[
            pl.BlockSpec((bm, K), lambda i: (i, 0)),
            pl.BlockSpec((K, Cout), lambda i: (0, 0)),
            pl.BlockSpec((1, Cout), lambda i: (0, 0)),
        ],
        out_specs=pl.BlockSpec((bm, Cout), lambda i: (i, 0)),
        compiler_params=pltpu.CompilerParams(dimension_semantics=("parallel",)),
    )(x2d.astype(jnp.bfloat16), w2d.astype(jnp.bfloat16),
      bias[None, :].astype(jnp.float32))
    return out[:M]


# ------------------------------- glue helpers ------------------------------ #
def _im2col_3x3(x_nhwc):
    """(N,H,W,C) -> (N*H*W, 9*C): 'same'-padded 3x3 taps folded into the
    contraction dimension (tap-major, channel-minor)."""
    N, H, W, C = x_nhwc.shape
    xp = jnp.pad(x_nhwc, ((0, 0), (1, 1), (1, 1), (0, 0)))
    taps = [xp[:, dy:dy + H, dx:dx + W, :] for dy in range(3) for dx in range(3)]
    return jnp.concatenate(taps, axis=-1).reshape(N * H * W, 9 * C)


def _fold_bn(p, eps=1e-5):
    """Fold inference BatchNorm + conv bias: returns (w * scale, bias)."""
    scale = p["gamma"] / jnp.sqrt(p["rvar"] + eps)         # (Cout,)
    w = p["w"] * scale                                     # broadcast over Cout
    b = (p["b"] - p["rmean"]) * scale + p["beta"]
    return w, b


# --------------------------- parameter creation ----------------------------- #
def init_convbn(key, cin, cout, k):
    ks = jax.random.split(key, 6)
    fan_in = cin * k * k
    return dict(
        w=jax.random.normal(ks[0], (k, k, cin, cout), jnp.float32) / math.sqrt(fan_in),
        b=0.1 * jax.random.normal(ks[1], (cout,), jnp.float32),
        gamma=1.0 + 0.1 * jax.random.normal(ks[2], (cout,), jnp.float32),
        beta=0.1 * jax.random.normal(ks[3], (cout,), jnp.float32),
        rmean=0.1 * jax.random.normal(ks[4], (cout,), jnp.float32),
        rvar=jax.random.uniform(ks[5], (cout,), jnp.float32, minval=0.5, maxval=1.5),
    )


def init_inception4e(key):
    ks = jax.random.split(key, 6)
    return dict(
        b11=init_convbn(ks[0], 256, 16, 1),
        b12=init_convbn(ks[1], 16, 32, 3),
        b13=init_convbn(ks[2], 32, 32, 3),
        b21=init_convbn(ks[3], 256, 32, 1),
        b22=init_convbn(ks[4], 32, 96, 3),
        b31=init_convbn(ks[5], 256, 128, 1),
    )


# ------------------------------- forward pass -------------------------------- #
def inception4e_forward(params, x_nchw):
    x = jnp.transpose(x_nchw, (0, 2, 3, 1))                # NCHW -> NHWC
    N, H, W, Cin = x.shape
    M = N * H * W

    fw11, fb11 = _fold_bn(params["b11"])
    fw12, fb12 = _fold_bn(params["b12"])
    fw13, fb13 = _fold_bn(params["b13"])
    fw21, fb21 = _fold_bn(params["b21"])
    fw22, fb22 = _fold_bn(params["b22"])
    fw31, fb31 = _fold_bn(params["b31"])

    # ---- level 1: the three 1x1 branches fused into one 176-wide matmul ----
    w1 = jnp.concatenate([fw11.reshape(Cin, 16),
                          fw21.reshape(Cin, 32),
                          fw31.reshape(Cin, 128)], axis=-1)          # (256, 176)
    bias1 = jnp.concatenate([fb11, fb21, fb31])
    y1 = matmul_bias_relu(x.reshape(M, Cin), w1, bias1)              # (M, 176)
    left1 = y1[:, 0:16].reshape(N, H, W, 16)                         # branch11
    mid1 = y1[:, 16:48].reshape(N, H, W, 32)                         # branch21
    right = y1[:, 48:176]                                            # branch31, (M, 128)

    # ---- level 2: branch12 3x3 (16 -> 32), taps folded: K = 144 ----
    left2 = matmul_bias_relu(_im2col_3x3(left1), fw12.reshape(9 * 16, 32), fb12)
    left2 = left2.reshape(N, H, W, 32)

    # ---- level 3: branch13 (32->32) + branch22 (32->96), block-diag fused ----
    # Lane-dense (M, 128) output already ordered [left(32) | middle(96)].
    x3 = _im2col_3x3(jnp.concatenate([left2, mid1], axis=-1))        # (M, 576)
    w3 = jnp.zeros((9, 64, 128), jnp.float32)
    w3 = w3.at[:, 0:32, 0:32].set(fw13.reshape(9, 32, 32))
    w3 = w3.at[:, 32:64, 32:128].set(fw22.reshape(9, 32, 96))
    bias3 = jnp.concatenate([fb13, fb22])
    left_mid = matmul_bias_relu(x3, w3.reshape(9 * 64, 128), bias3)  # (M, 128)

    out = jnp.concatenate([left_mid, right], axis=-1)                # (M, 256) [l,m,r]
    out = out.reshape(N, H, W, 256)
    return jnp.transpose(out, (0, 3, 1, 2))                          # NHWC -> NCHW


# ---------------------------- pure-JAX reference ----------------------------- #
def _ref_conv_bn_relu(x_nhwc, p, eps=1e-5):
    kh = p["w"].shape[0]
    pad = (kh - 1) // 2
    y = lax.conv_general_dilated(
        x_nhwc, p["w"], window_strides=(1, 1),
        padding=[(pad, pad), (pad, pad)],
        dimension_numbers=("NHWC", "HWIO", "NHWC"),
        precision=lax.Precision.HIGHEST,
    ) + p["b"]
    y = (y - p["rmean"]) / jnp.sqrt(p["rvar"] + eps) * p["gamma"] + p["beta"]
    return jnp.maximum(y, 0.0)


def _ref_forward(params, x_nchw):
    x = jnp.transpose(x_nchw, (0, 2, 3, 1))
    left = _ref_conv_bn_relu(x, params["b11"])
    left = _ref_conv_bn_relu(left, params["b12"])
    left = _ref_conv_bn_relu(left, params["b13"])
    mid = _ref_conv_bn_relu(x, params["b21"])
    mid = _ref_conv_bn_relu(mid, params["b22"])
    right = _ref_conv_bn_relu(x, params["b31"])
    out = jnp.concatenate([left, mid, right], axis=-1)
    return jnp.transpose(out, (0, 3, 1, 2))


if __name__ == "__main__":
    key = jax.random.PRNGKey(0)
    kp, kx = jax.random.split(key)
    params = init_inception4e(kp)

    # Inception4e requires 256 input channels; keep batch/spatial small.
    x = jax.random.normal(kx, (2, 256, 16, 16), jnp.float32)   # NCHW like PyTorch

    out = jax.block_until_ready(jax.jit(inception4e_forward)(params, x))
    assert out.shape == (2, 256, 16, 16), out.shape            # 32 + 96 + 128 = 256

    ref = jax.block_until_ready(_ref_forward(params, x))
    # Tolerance accounts for bf16 matmul operands (f32 accumulation) through
    # up to three stacked conv layers vs. the HIGHEST-precision f32 reference.
    np.testing.assert_allclose(np.asarray(out), np.asarray(ref), rtol=2e-2, atol=5e-2)

    print("KERNEL_OK")
</pallas_src>

<mosaic_0001>
module attributes {stable_mosaic.version = 11 : i64} {
  func.func @_matmul_bias_relu_kernel(%arg0: i32, %arg1: memref<256x256xbf16, #tpu.memory_space<vmem>>, %arg2: memref<256x176xbf16, #tpu.memory_space<vmem>>, %arg3: memref<1x176xf32, #tpu.memory_space<vmem>>, %arg4: memref<256x176xf32, #tpu.memory_space<vmem>>) attributes {dimension_semantics = [#tpu.dimension_semantics<parallel>], iteration_bounds = array<i64: 2>, scalar_prefetch = 0 : i64, scratch_operands = 0 : i64, tpu.core_type = #tpu.core_type<tc>, window_params = [{transform_indices = @transform_0, window_bounds = array<i64: 256, 256>}, {pipeline_mode = #tpu.pipeline_mode<synchronous>, transform_indices = @transform_1, window_bounds = array<i64: 256, 176>}, {pipeline_mode = #tpu.pipeline_mode<synchronous>, transform_indices = @transform_2, window_bounds = array<i64: 1, 176>}, {transform_indices = @transform_3, window_bounds = array<i64: 256, 176>}]} {
    %c0 = arith.constant 0 : index
    %c0_0 = arith.constant 0 : index
    %0 = vector.load %arg1[%c0, %c0_0] : memref<256x256xbf16, #tpu.memory_space<vmem>>, vector<256x256xbf16>
    %c0_1 = arith.constant 0 : index
    %c0_2 = arith.constant 0 : index
    %1 = vector.load %arg2[%c0_1, %c0_2] : memref<256x176xbf16, #tpu.memory_space<vmem>>, vector<256x176xbf16>
    %cst = arith.constant dense<0.000000e+00> : vector<256x176xf32>
    %2 = tpu.matmul %0, %1, %cst {dimension_numbers = #tpu.dot_dimension_numbers<[1], [0], [0], [1], [0, 0, 1, 1], [], []>} : vector<256x256xbf16>, vector<256x176xbf16>, vector<256x176xf32> -> vector<256x176xf32>
    %c0_3 = arith.constant 0 : index
    %c0_4 = arith.constant 0 : index
    %3 = vector.load %arg3[%c0_3, %c0_4] : memref<1x176xf32, #tpu.memory_space<vmem>>, vector<1x176xf32>
    %4 = vector.broadcast %3 : vector<1x176xf32> to vector<256x176xf32>
    %5 = arith.addf %2, %4 : vector<256x176xf32>
    %cst_5 = arith.constant 0.000000e+00 : f32
    %6 = vector.broadcast %cst_5 : f32 to vector<256x176xf32>
    %7 = arith.maximumf %5, %6 : vector<256x176xf32>
    %c0_6 = arith.constant 0 : index
    %c0_7 = arith.constant 0 : index
    %8 = vector.load %arg4[%c0_6, %c0_7] : memref<256x176xf32, #tpu.memory_space<vmem>>, vector<256x176xf32>
    tpu.vector_store %arg4[%c0_6, %c0_7], %7 {strides = array<i32>} : memref<256x176xf32, #tpu.memory_space<vmem>>, vector<256x176xf32>,
    return
  }
  func.func @transform_0(%arg0: i32) -> (i32, i32) {
    %c0_i32 = arith.constant 0 : i32
    %c0_i32_0 = arith.constant 0 : i32
    return %arg0, %c0_i32 : i32, i32
  }
  func.func @transform_1(%arg0: i32) -> (i32, i32) {
    %c0_i32 = arith.constant 0 : i32
    %c0_i32_0 = arith.constant 0 : i32
    %c0_i32_1 = arith.constant 0 : i32
    return %c0_i32, %c0_i32_0 : i32, i32
  }
  func.func @transform_2(%arg0: i32) -> (i32, i32) {
    %c0_i32 = arith.constant 0 : i32
    %c0_i32_0 = arith.constant 0 : i32
    %c0_i32_1 = arith.constant 0 : i32
    return %c0_i32, %c0_i32_0 : i32, i32
  }
  func.func @transform_3(%arg0: i32) -> (i32, i32) {
    %c0_i32 = arith.constant 0 : i32
    %c0_i32_0 = arith.constant 0 : i32
    return %arg0, %c0_i32 : i32, i32
  }
}

module attributes {stable_mosaic.version = 11 : i64} {
  func.func @_matmul_bias_relu_kernel(%arg0: i32, %arg1: memref<256x144xbf16, #tpu.memory_space<vmem>>, %arg2: memref<144x32xbf16, #tpu.memory_space<vmem>>, %arg3: memref<1x32xf32, #tpu.memory_space<vmem>>, %arg4: memref<256x32xf32, #tpu.memory_space<vmem>>) attributes {dimension_semantics = [#tpu.dimension_semantics<parallel>], iteration_bounds = array<i64: 2>, scalar_prefetch = 0 : i64, scratch_operands = 0 : i64, tpu.core_type = #tpu.core_type<tc>, window_params = [{transform_indices = @transform_0, window_bounds = array<i64: 256, 144>}, {pipeline_mode = #tpu.pipeline_mode<synchronous>, transform_indices = @transform_1, window_bounds = array<i64: 144, 32>}, {pipeline_mode = #tpu.pipeline_mode<synchronous>, transform_indices = @transform_2, window_bounds = array<i64: 1, 32>}, {transform_indices = @transform_3, window_bounds = array<i64: 256, 32>}]} {
    %c0 = arith.constant 0 : index
    %c0_0 = arith.constant 0 : index
    %0 = vector.load %arg1[%c0, %c0_0] : memref<256x144xbf16, #tpu.memory_space<vmem>>, vector<256x144xbf16>
    %c0_1 = arith.constant 0 : index
    %c0_2 = arith.constant 0 : index
    %1 = vector.load %arg2[%c0_1, %c0_2] : memref<144x32xbf16, #tpu.memory_space<vmem>>, vector<144x32xbf16>
    %cst = arith.constant dense<0.000000e+00> : vector<256x32xf32>
    %2 = tpu.matmul %0, %1, %cst {dimension_numbers = #tpu.dot_dimension_numbers<[1], [0], [0], [1], [0, 0, 1, 1], [], []>} : vector<256x144xbf16>, vector<144x32xbf16>, vector<256x32xf32> -> vector<256x32xf32>
    %c0_3 = arith.constant 0 : index
    %c0_4 = arith.constant 0 : index
    %3 = vector.load %arg3[%c0_3, %c0_4] : memref<1x32xf32, #tpu.memory_space<vmem>>, vector<1x32xf32>
    %4 = vector.broadcast %3 : vector<1x32xf32> to vector<256x32xf32>
    %5 = arith.addf %2, %4 : vector<256x32xf32>
    %cst_5 = arith.constant 0.000000e+00 : f32
    %6 = vector.broadcast %cst_5 : f32 to vector<256x32xf32>
    %7 = arith.maximumf %5, %6 : vector<256x32xf32>
    %c0_6 = arith.constant 0 : index
    %c0_7 = arith.constant 0 : index
    %8 = vector.load %arg4[%c0_6, %c0_7] : memref<256x32xf32, #tpu.memory_space<vmem>>, vector<256x32xf32>
    tpu.vector_store %arg4[%c0_6, %c0_7], %7 {strides = array<i32>} : memref<256x32xf32, #tpu.memory_space<vmem>>, vector<256x32xf32>,
    return
  }
  func.func @transform_0(%arg0: i32) -> (i32, i32) {
    %c0_i32 = arith.constant 0 : i32
    %c0_i32_0 = arith.constant 0 : i32
    return %arg0, %c0_i32 : i32, i32
  }
  func.func @transform_1(%arg0: i32) -> (i32, i32) {
    %c0_i32 = arith.constant 0 : i32
    %c0_i32_0 = arith.constant 0 : i32
    %c0_i32_1 = arith.constant 0 : i32
    return %c0_i32, %c0_i32_0 : i32, i32
  }
  func.func @transform_2(%arg0: i32) -> (i32, i32) {
    %c0_i32 = arith.constant 0 : i32
    %c0_i32_0 = arith.constant 0 : i32
    %c0_i32_1 = arith.constant 0 : i32
    return %c0_i32, %c0_i32_0 : i32, i32
  }
  func.func @transform_3(%arg0: i32) -> (i32, i32) {
    %c0_i32 = arith.constant 0 : i32
    %c0_i32_0 = arith.constant 0 : i32
    return %arg0, %c0_i32 : i32, i32
  }
}

module attributes {stable_mosaic.version = 11 : i64} {
  func.func @_matmul_bias_relu_kernel(%arg0: i32, %arg1: memref<256x576xbf16, #tpu.memory_space<vmem>>, %arg2: memref<576x128xbf16, #tpu.memory_space<vmem>>, %arg3: memref<1x128xf32, #tpu.memory_space<vmem>>, %arg4: memref<256x128xf32, #tpu.memory_space<vmem>>) attributes {dimension_semantics = [#tpu.dimension_semantics<parallel>], iteration_bounds = array<i64: 2>, scalar_prefetch = 0 : i64, scratch_operands = 0 : i64, tpu.core_type = #tpu.core_type<tc>, window_params = [{transform_indices = @transform_0, window_bounds = array<i64: 256, 576>}, {pipeline_mode = #tpu.pipeline_mode<synchronous>, transform_indices = @transform_1, window_bounds = array<i64: 576, 128>}, {pipeline_mode = #tpu.pipeline_mode<synchronous>, transform_indices = @transform_2, window_bounds = array<i64: 1, 128>}, {transform_indices = @transform_3, window_bounds = array<i64: 256, 128>}]} {
    %c0 = arith.constant 0 : index
    %c0_0 = arith.constant 0 : index
    %0 = vector.load %arg1[%c0, %c0_0] : memref<256x576xbf16, #tpu.memory_space<vmem>>, vector<256x576xbf16>
    %c0_1 = arith.constant 0 : index
    %c0_2 = arith.constant 0 : index
    %1 = vector.load %arg2[%c0_1, %c0_2] : memref<576x128xbf16, #tpu.memory_space<vmem>>, vector<576x128xbf16>
    %cst = arith.constant dense<0.000000e+00> : vector<256x128xf32>
    %2 = tpu.matmul %0, %1, %cst {dimension_numbers = #tpu.dot_dimension_numbers<[1], [0], [0], [1], [0, 0, 1, 1], [], []>} : vector<256x576xbf16>, vector<576x128xbf16>, vector<256x128xf32> -> vector<256x128xf32>
    %c0_3 = arith.constant 0 : index
    %c0_4 = arith.constant 0 : index
    %3 = vector.load %arg3[%c0_3, %c0_4] : memref<1x128xf32, #tpu.memory_space<vmem>>, vector<1x128xf32>
    %4 = vector.broadcast %3 : vector<1x128xf32> to vector<256x128xf32>
    %5 = arith.addf %2, %4 : vector<256x128xf32>
    %cst_5 = arith.constant 0.000000e+00 : f32
    %6 = vector.broadcast %cst_5 : f32 to vector<256x128xf32>
    %7 = arith.maximumf %5, %6 : vector<256x128xf32>
    %c0_6 = arith.constant 0 : index
    %c0_7 = arith.constant 0 : index
    %8 = vector.load %arg4[%c0_6, %c0_7] : memref<256x128xf32, #tpu.memory_space<vmem>>, vector<256x128xf32>
    tpu.vector_store %arg4[%c0_6, %c0_7], %7 {strides = array<i32>} : memref<256x128xf32, #tpu.memory_space<vmem>>, vector<256x128xf32>,
    return
  }
  func.func @transform_0(%arg0: i32) -> (i32, i32) {
    %c0_i32 = arith.constant 0 : i32
    %c0_i32_0 = arith.constant 0 : i32
    return %arg0, %c0_i32 : i32, i32
  }
  func.func @transform_1(%arg0: i32) -> (i32, i32) {
    %c0_i32 = arith.constant 0 : i32
    %c0_i32_0 = arith.constant 0 : i32
    %c0_i32_1 = arith.constant 0 : i32
    return %c0_i32, %c0_i32_0 : i32, i32
  }
  func.func @transform_2(%arg0: i32) -> (i32, i32) {
    %c0_i32 = arith.constant 0 : i32
    %c0_i32_0 = arith.constant 0 : i32
    %c0_i32_1 = arith.constant 0 : i32
    return %c0_i32, %c0_i32_0 : i32, i32
  }
  func.func @transform_3(%arg0: i32) -> (i32, i32) {
    %c0_i32 = arith.constant 0 : i32
    %c0_i32_0 = arith.constant 0 : i32
    return %arg0, %c0_i32 : i32, i32
  }
}

</mosaic_0001>

<bundles_post_ra>
// kernel: inception4e_forward.3
= control target key start
LH: loop header
LB: loop body
LE: loop exit
PB: predicated region body
PF: predicated region fallthrough
CT: control target
= control target key end

     0   :  { %s1198_s12 = smov 0   ;;  %s1518_s0 = inlined_call_operand.vmem [shape: bf16[512,256], index: 0, kind: input, shape index: {}]   ;;  %s1519_s1 = inlined_call_operand.vmem [shape: bf16[256,176], index: 1, kind: input, shape index: {}]   ;;  %s1520_s2 = inlined_call_operand.vmem [shape: f32[1,176], index: 2, kind: input, shape index: {}]   ;;  %s1521_s3 = inlined_call_operand.vmem [shape: f32[512,176], index: 3, kind: output, shape index: {}]  }
   0x1 LB: > { %s955_s13 = sadd.s32 4294967295, %s1176_s12   ;;  %p959_p0 = scmp.ge.s32.totalorder %s1176_s12, 1  ;;  %s1176_s12 = sphi %s1198_s12, %s13_s12  }
   0x2   : > { %p139_p1 = scmp.lt.s32.totalorder %s1176_s12, 3 }
   0x4   : > { %p140_p2 = pnand %p959_p0, %p139_p1 }
   0x5   : > { %s960_s24 = sshll.u32 (!%p140_p2), %s955_s13, 5 }
   0x6   : > { %143 = sbr.rel (%p140_p2) target bundleno = 336 (0x150), region = 32  ;;  %p166_p3 = scmp.lt.s32.totalorder (!%p140_p2), %s960_s24, 63 }
   0xb   : > { %v1074_v0 = vld [vmem:[%s1519_s1 + $0x74] ss:$8 sps:$4 sm:$0xff]   ;;  %v1076_v1 = vld [vmem:[%s1519_s1 + $0x70] ss:$8 sps:$4 sm:$0xff]   ;;  %v1077_v2 = vld [vmem:[%s1519_s1 + $0x64] ss:$8 sps:$4 sm:$0xff]  }
   0xc   : > { %575 = vmatprep.subr.bf16.mxu0 %v1074_v0  ;;  %1034 = vmatprep.subr.bf16.mxu1 %v1074_v0  ;;  %v1079_v3 = vld [vmem:[%s1519_s1 + $0x60] ss:$8 sps:$4 sm:$0xff]   ;;  %v1080_v4 = vld [vmem:[%s1519_s1 + $0x54] ss:$8 sps:$4 sm:$0xff]   ;;  %v1082_v5 = vld [vmem:[%s1519_s1 + $0x50] ss:$8 sps:$4 sm:$0xff]   ;;  %v245_v0 = vlaneseq }
   0xd   : > { %576 = vmatpush1.bf16.msra.mxu0 %v1076_v1  ;;  %1050 = vmatpush1.bf16.msra.mxu1 %v1076_v1  ;;  %v1083_v6 = vld [vmem:[%s1519_s1 + $0x44] ss:$8 sps:$4 sm:$0xff]   ;;  %v1085_v7 = vld [vmem:[%s1519_s1 + $0x40] ss:$8 sps:$4 sm:$0xff]   ;;  %v1086_v8 = vld [vmem:[%s1519_s1 + $0x34] ss:$8 sps:$4 sm:$0xff]  }
   0xe   : > { %577 = vmatprep.subr.bf16.mxu0 %v1077_v2  ;;  %1035 = vmatprep.subr.bf16.mxu1 %v1077_v2  ;;  %s1523_s24 = smov (!%p166_p3, %s960_s24), 63  ;;  %v1088_v9 = vld [vmem:[%s1519_s1 + $0x30] ss:$8 sps:$4 sm:$0xff]   ;;  %v1089_v10 = vld [vmem:[%s1519_s1 + $0x24] ss:$8 sps:$4 sm:$0xff]   ;;  %v246_v1 = vshrl.u32 %v245_v0, 7 }
   0xf   : > { %s1032_s10 = sshll.u32 %s1523_s24, 3  ;;  %v1091_v11 = vld [vmem:[%s1519_s1 + $0x20] ss:$8 sps:$4 sm:$0xff]   ;;  %v1092_v12 = vld [vmem:[%s1519_s1 + $0x14] ss:$8 sps:$4 sm:$0xff]   ;;  %s1033_s9 = sshll.u32 %s1523_s24, 4 }
  0x10   : > { %s1248_s16 = scalar_lea.vmem %s1518_s0, %s1032_s10  ;;  %v1094_v14 = vld [vmem:[%s1519_s1 + $0x10] ss:$8 sps:$4 sm:$0xff]   ;;  %v1095_v16 = vld [vmem:[%s1519_s1 + $0x4] ss:$8 sps:$4 sm:$0xff]   ;;  %v1097_v17 = vld [vmem:[%s1519_s1] ss:$8 sps:$4 sm:$0xff]   ;;  %s1355_s11 = scalar_lea.vmem %s1521_s3, %s1033_s9 }
  0x11   : > { %578 = vmatpush1.bf16.msra.mxu0 %v1079_v3  ;;  %1051 = vmatpush1.bf16.msra.mxu1 %v1079_v3  ;;  %v1124_v13 = vld [vmem:[%s1248_s16 + $0x4] ss:$8 sps:$4 sm:$0xff]   ;;  %v1098_v18 = vld [vmem:[%s1519_s1 + $0xf4] ss:$8 sps:$4 sm:$0xff]   ;;  %v1100_v19 = vld [vmem:[%s1519_s1 + $0xf0] ss:$8 sps:$4 sm:$0xff]  }
  0x12   : > { %579 = vmatprep.subr.bf16.mxu0 %v1080_v4  ;;  %1036 = vmatprep.subr.bf16.mxu1 %v1080_v4  ;;  %v1127_v15 = vld [vmem:[%s1248_s16 + $0x84] ss:$8 sps:$4 sm:$0xff]   ;;  %v1103_v21 = vld [vmem:[%s1519_s1 + $0xe0] ss:$8 sps:$4 sm:$0xff]   ;;  %v1104_v22 = vld [vmem:[%s1519_s1 + $0xd4] ss:$8 sps:$4 sm:$0xff]  }
  0x13   : > { %607 = vmatprep.mubr.bf16.mxu0 %v1124_v13  ;;  %687 = vmatprep.mubr.bf16.mxu1 %v1127_v15  ;;  %v1101_v20 = vld [vmem:[%s1519_s1 + $0xe4] ss:$8 sps:$4 sm:$0xff]   ;;  %v1106_v23 = vld [vmem:[%s1519_s1 + $0xd0] ss:$8 sps:$4 sm:$0xff]   ;;  %v1109_v25 = vld [vmem:[%s1519_s1 + $0xc0] ss:$8 sps:$4 sm:$0xff]  }
  0x14   : > { %v1107_v24 = vld [vmem:[%s1519_s1 + $0xc4] ss:$8 sps:$4 sm:$0xff]   ;;  %v1110_v26 = vld [vmem:[%s1519_s1 + $0xb4] ss:$8 sps:$4 sm:$0xff]   ;;  %v1112_v27 = vld [vmem:[%s1519_s1 + $0xb0] ss:$8 sps:$4 sm:$0xff]  }
  0x15   : > { %580 = vmatpush1.bf16.msra.mxu0 %v1082_v5  ;;  %1052 = vmatpush1.bf16.msra.mxu1 %v1082_v5  ;;  %v1113_v28 = vld [vmem:[%s1519_s1 + $0xa4] ss:$8 sps:$4 sm:$0xff]   ;;  %v1115_v29 = vld [vmem:[%s1519_s1 + $0xa0] ss:$8 sps:$4 sm:$0xff]   ;;  %v1116_v30 = vld [vmem:[%s1519_s1 + $0x94] ss:$8 sps:$4 sm:$0xff]  }
  0x16   : > { %581 = vmatprep.subr.bf16.mxu0 %v1083_v6  ;;  %1037 = vmatprep.subr.bf16.mxu1 %v1083_v6  ;;  %v1118_v31 = vld [vmem:[%s1519_s1 + $0x90] ss:$8 sps:$4 sm:$0xff]   ;;  %v1119_v32 = vld [vmem:[%s1519_s1 + $0x84] ss:$8 sps:$4 sm:$0xff]   ;;  %v1121_v33 = vld [vmem:[%s1519_s1 + $0x80] ss:$8 sps:$4 sm:$0xff]  }
  0x17   : > { %v1122_v34 = vld [vmem:[%s1248_s16] ss:$8 sps:$4 sm:$0xff]   ;;  %v1128_v36 = vld [vmem:[%s1248_s16 + $0x14] ss:$8 sps:$4 sm:$0xff]   ;;  %v1132_v38 = vld [vmem:[%s1248_s16 + $0x10] ss:$8 sps:$4 sm:$0xff]  }
  0x18   : > { %v1125_v35 = vld [vmem:[%s1248_s16 + $0x80] ss:$8 sps:$4 sm:$0xff]   ;;  %v1130_v37 = vld [vmem:[%s1248_s16 + $0x94] ss:$8 sps:$4 sm:$0xff]   ;;  %v1133_v39 = vld [vmem:[%s1248_s16 + $0x90] ss:$8 sps:$4 sm:$0xff]  }
  0x19   : > { %582 = vmatpush1.bf16.msra.mxu0 %v1085_v7  ;;  %1053 = vmatpush1.bf16.msra.mxu1 %v1085_v7  ;;  %v1134_v40 = vld [vmem:[%s1248_s16 + $0x24] ss:$8 sps:$4 sm:$0xff]   ;;  %v1138_v42 = vld [vmem:[%s1248_s16 + $0x20] ss:$8 sps:$4 sm:$0xff]   ;;  %v1140_v44 = vld [vmem:[%s1248_s16 + $0x34] ss:$8 sps:$4 sm:$0xff]  }
  0x1a   : > { %583 = vmatprep.subr.bf16.mxu0 %v1086_v8  ;;  %1038 = vmatprep.subr.bf16.mxu1 %v1086_v8  ;;  %v1136_v41 = vld [vmem:[%s1248_s16 + $0xa4] ss:$8 sps:$4 sm:$0xff]   ;;  %v1139_v43 = vld [vmem:[%s1248_s16 + $0xa0] ss:$8 sps:$4 sm:$0xff]   ;;  %v1142_v45 = vld [vmem:[%s1248_s16 + $0xb4] ss:$8 sps:$4 sm:$0xff]  }
  0x1b   : > { %v1144_v46 = vld [vmem:[%s1248_s16 + $0x30] ss:$8 sps:$4 sm:$0xff]   ;;  %v1146_v48 = vld [vmem:[%s1248_s16 + $0x44] ss:$8 sps:$4 sm:$0xff]   ;;  %v1150_v50 = vld [vmem:[%s1248_s16 + $0x40] ss:$8 sps:$4 sm:$0xff]  }
  0x1c   : > { %v1145_v47 = vld [vmem:[%s1248_s16 + $0xb0] ss:$8 sps:$4 sm:$0xff]   ;;  %v1148_v49 = vld [vmem:[%s1248_s16 + $0xc4] ss:$8 sps:$4 sm:$0xff]   ;;  %v1151_v51 = vld [vmem:[%s1248_s16 + $0xc0] ss:$8 sps:$4 sm:$0xff]  }
  0x1d   : > { %584 = vmatpush1.bf16.msra.mxu0 %v1088_v9  ;;  %1054 = vmatpush1.bf16.msra.mxu1 %v1088_v9  ;;  %v1152_v52 = vld [vmem:[%s1248_s16 + $0x54] ss:$8 sps:$4 sm:$0xff]   ;;  %v1156_v54 = vld [vmem:[%s1248_s16 + $0x50] ss:$8 sps:$4 sm:$0xff]   ;;  %v1158_v56 = vld [vmem:[%s1248_s16 + $0x64] ss:$8 sps:$4 sm:$0xff]  }
  0x1e   : > { %585 = vmatprep.subr.bf16.mxu0 %v1089_v10  ;;  %1039 = vmatprep.subr.bf16.mxu1 %v1089_v10  ;;  %v1154_v53 = vld [vmem:[%s1248_s16 + $0xd4] ss:$8 sps:$4 sm:$0xff]   ;;  %v1157_v55 = vld [vmem:[%s1248_s16 + $0xd0] ss:$8 sps:$4 sm:$0xff]   ;;  %v1160_v57 = vld [vmem:[%s1248_s16 + $0xe4] ss:$8 sps:$4 sm:$0xff]  }
  0x1f   : > { %v1162_v58 = vld [vmem:[%s1248_s16 + $0x60] ss:$8 sps:$4 sm:$0xff]   ;;  %v1164_v60 = vld [vmem:[%s1248_s16 + $0x74] ss:$8 sps:$4 sm:$0xff]   ;;  %v1168_v62 = vld [vmem:[%s1248_s16 + $0x70] ss:$8 sps:$4 sm:$0xff]  }
  0x20   : > { %v1163_v59 = vld [vmem:[%s1248_s16 + $0xe0] ss:$8 sps:$4 sm:$0xff]   ;;  %v1166_v61 = vld [vmem:[%s1248_s16 + $0xf4] ss:$8 sps:$4 sm:$0xff]   ;;  %v1169_v63 = vld [vmem:[%s1248_s16 + $0xf0] ss:$8 sps:$4 sm:$0xff]  }
  0x21   : > { %586 = vmatpush1.bf16.msra.mxu0 %v1091_v11  ;;  %1055 = vmatpush1.bf16.msra.mxu1 %v1091_v11  ;;  %v247_v2 = vsub.s32 0, %v246_v1  ;;  %v243_v3 = vld [vmem:[%s1520_s2] sm:$0x3]  ;;  %v251_v4 = vsub.s32 1, %v246_v1  ;;  %vm833_vm0 = vcmask 392192  }
  0x22   : > { %587 = vmatprep.subr.bf16.mxu0 %v1092_v12  ;;  %1040 = vmatprep.subr.bf16.mxu1 %v1092_v12 }
  0x23   : > { %v1345_v5 = vrot.slane %v243_v3, %v247_v2  ;;  %v1348_v6 = vrot.slane %v243_v3, %v251_v4 }
  0x25   : > { %588 = vmatpush1.bf16.msra.mxu0 %v1094_v14  ;;  %1056 = vmatpush1.bf16.msra.mxu1 %v1094_v14 }
  0x26   : > { %589 = vmatprep.subr.bf16.mxu0 %v1095_v16  ;;  %1041 = vmatprep.subr.bf16.mxu1 %v1095_v16 }
  0x29   : > { %590 = vmatpush1.bf16.msra.mxu0 %v1097_v17  ;;  %1057 = vmatpush1.bf16.msra.mxu1 %v1097_v17 }
  0x2a   : > { %591 = vmatprep.subr.bf16.mxu0 %v1098_v18  ;;  %1042 = vmatprep.subr.bf16.mxu1 %v1098_v18 }
  0x2d   : > { %592 = vmatpush2.bf16.msra.mxu0 %v1100_v19  ;;  %1058 = vmatpush2.bf16.msra.mxu1 %v1100_v19 }
  0x2e   : > { %593 = vmatprep.subr.bf16.mxu0 %v1101_v20  ;;  %1043 = vmatprep.subr.bf16.mxu1 %v1101_v20 }
  0x31   : > { %594 = vmatpush2.bf16.msra.mxu0 %v1103_v21  ;;  %1059 = vmatpush2.bf16.msra.mxu1 %v1103_v21 }
  0x32   : > { %595 = vmatprep.subr.bf16.mxu0 %v1104_v22  ;;  %1044 = vmatprep.subr.bf16.mxu1 %v1104_v22 }
  0x35   : > { %596 = vmatpush2.bf16.msra.mxu0 %v1106_v23  ;;  %1060 = vmatpush2.bf16.msra.mxu1 %v1106_v23 }
  0x36   : > { %597 = vmatprep.subr.bf16.mxu0 %v1107_v24  ;;  %1045 = vmatprep.subr.bf16.mxu1 %v1107_v24 }
  0x39   : > { %598 = vmatpush2.bf16.msra.mxu0 %v1109_v25  ;;  %1061 = vmatpush2.bf16.msra.mxu1 %v1109_v25 }
  0x3a   : > { %599 = vmatprep.subr.bf16.mxu0 %v1110_v26  ;;  %1046 = vmatprep.subr.bf16.mxu1 %v1110_v26 }
  0x3d   : > { %600 = vmatpush2.bf16.msra.mxu0 %v1112_v27  ;;  %1062 = vmatpush2.bf16.msra.mxu1 %v1112_v27 }
  0x3e   : > { %601 = vmatprep.subr.bf16.mxu0 %v1113_v28  ;;  %1047 = vmatprep.subr.bf16.mxu1 %v1113_v28 }
  0x41   : > { %602 = vmatpush2.bf16.msra.mxu0 %v1115_v29  ;;  %1063 = vmatpush2.bf16.msra.mxu1 %v1115_v29 }
  0x42   : > { %603 = vmatprep.subr.bf16.mxu0 %v1116_v30  ;;  %1048 = vmatprep.subr.bf16.mxu1 %v1116_v30 }
  0x45   : > { %604 = vmatpush2.bf16.msra.mxu0 %v1118_v31  ;;  %1064 = vmatpush2.bf16.msra.mxu1 %v1118_v31 }
  0x46   : > { %605 = vmatprep.subr.bf16.mxu0 %v1119_v32  ;;  %1049 = vmatprep.subr.bf16.mxu1 %v1119_v32 }
  0x49   : > { %606 = vmatpush2.bf16.msra.mxu0 %v1121_v33  ;;  %1065 = vmatpush2.bf16.msra.mxu1 %v1121_v33 }
  0x4c   : > { %608 = vmatmul.mubr.bf16.vlgmr.msra.gmra.mxu0 %v1122_v34  ;;  %688 = vmatmul.mubr.bf16.vlgmr.msra.gmra.mxu1 %v1125_v35 }
  0x4d   : > { %617 = vmatprep.mubr.bf16.mxu0 %v1128_v36  ;;  %697 = vmatprep.mubr.bf16.mxu1 %v1130_v37 }
  0x54   : > { %618 = vmatmul.mubr.bf16.gmra.mxu0 %v1132_v38  ;;  %698 = vmatmul.mubr.bf16.gmra.mxu1 %v1133_v39 }
  0x55   : > { %627 = vmatprep.mubr.bf16.mxu0 %v1134_v40  ;;  %707 = vmatprep.mubr.bf16.mxu1 %v1136_v41 }
  0x5c   : > { %628 = vmatmul.mubr.bf16.gmra.mxu0 %v1138_v42  ;;  %708 = vmatmul.mubr.bf16.gmra.mxu1 %v1139_v43 }
  0x5d   : > { %637 = vmatprep.mubr.bf16.mxu0 %v1140_v44  ;;  %717 = vmatprep.mubr.bf16.mxu1 %v1142_v45 }
  0x64   : > { %638 = vmatmul.mubr.bf16.gmra.mxu0 %v1144_v46  ;;  %718 = vmatmul.mubr.bf16.gmra.mxu1 %v1145_v47 }
  0x65   : > { %647 = vmatprep.mubr.bf16.mxu0 %v1146_v48  ;;  %727 = vmatprep.mubr.bf16.mxu1 %v1148_v49 }
  0x6c   : > { %648 = vmatmul.mubr.bf16.gmra.mxu0 %v1150_v50  ;;  %728 = vmatmul.mubr.bf16.gmra.mxu1 %v1151_v51 }
  0x6d   : > { %657 = vmatprep.mubr.bf16.mxu0 %v1152_v52  ;;  %737 = vmatprep.mubr.bf16.mxu1 %v1154_v53 }
  0x74   : > { %658 = vmatmul.mubr.bf16.gmra.mxu0 %v1156_v54  ;;  %738 = vmatmul.mubr.bf16.gmra.mxu1 %v1157_v55 }
  0x75   : > { %667 = vmatprep.mubr.bf16.mxu0 %v1158_v56  ;;  %747 = vmatprep.mubr.bf16.mxu1 %v1160_v57 }
  0x7c   : > { %668 = vmatmul.mubr.bf16.gmra.mxu0 %v1162_v58  ;;  %748 = vmatmul.mubr.bf16.gmra.mxu1 %v1163_v59 }
  0x7d   : > { %677 = vmatprep.mubr.bf16.mxu0 %v1164_v60  ;;  %757 = vmatprep.mubr.bf16.mxu1 %v1166_v61 }
  0x84   : > { %678 = vmatmul.mubr.bf16.gmra.mxu0 %v1168_v62  ;;  %758 = vmatmul.mubr.bf16.gmra.mxu1 %v1169_v63 }
 0x10c   : > { %v609_v7 = vpop.f32.mrf.mxu0  ;;  %v689_v8 = vpop.f32.mrf.mxu1 }
 0x10d   : > { %v610_v9 = vadd.f32 %v609_v7, %v1345_v5  ;;  %v690_v10 = vadd.f32 %v689_v8, %v1345_v5 }
 0x10e   : > { %v611_v11 = vpop.f32.mrf.mxu0  ;;  %v691_v12 = vpop.f32.mrf.mxu1 }
 0x10f   : > { %v768_v13 = vmax.f32 %v610_v9, 0.0  ;;  %v800_v14 = vmax.f32 %v690_v10, 0.0  ;;  %v612_v15 = vadd.f32 %v611_v11, %v1348_v6  ;;  %v692_v16 = vadd.f32 %v691_v12, %v1348_v6 }
 0x110   : > { %v613_v17 = vpop.f32.mrf.mxu0  ;;  %v693_v18 = vpop.f32.mrf.mxu1 }
 0x111   : > { %832 = vst [vmem:[%s1355_s11] sm:$0xff] %v768_v13  ;;  %865 = vst [vmem:[%s1355_s11 + $0x100] sm:$0xff] %v800_v14  ;;  %v769_v19 = vmax.f32 %v612_v15, 0.0  ;;  %v801_v20 = vmax.f32 %v692_v16, 0.0  ;;  %v614_v21 = vadd.f32 %v613_v17, %v1345_v5  ;;  %v694_v22 = vadd.f32 %v693_v18, %v1345_v5 }
 0x112   : > { %v615_v23 = vpop.f32.mrf.mxu0  ;;  %v695_v24 = vpop.f32.mrf.mxu1 }
 0x113   : > { %834 = vst.msk [vmem:[%s1355_s11 + $0x8] sm:$0xff] %vm833_vm0, %v769_v19  ;;  %866 = vst.msk [vmem:[%s1355_s11 + $0x108] sm:$0xff] %vm833_vm0, %v801_v20  ;;  %v770_v25 = vmax.f32 %v614_v21, 0.0  ;;  %v802_v26 = vmax.f32 %v694_v22, 0.0  ;;  %v616_v27 = vadd.f32 %v615_v23, %v1348_v6  ;;  %v696_v28 = vadd.f32 %v695_v24, %v1348_v6 }
 0x114   : > { %v619_v29 = vpop.f32.mrf.mxu0  ;;  %v699_v30 = vpop.f32.mrf.mxu1 }
 0x115   : > { %835 = vst [vmem:[%s1355_s11 + $0x10] sm:$0xff] %v770_v25  ;;  %867 = vst [vmem:[%s1355_s11 + $0x110] sm:$0xff] %v802_v26  ;;  %v771_v31 = vmax.f32 %v616_v27, 0.0  ;;  %v803_v32 = vmax.f32 %v696_v28, 0.0  ;;  %v620_v33 = vadd.f32 %v619_v29, %v1345_v5  ;;  %v700_v34 = vadd.f32 %v699_v30, %v1345_v5 }
 0x116   : > { %v621_v35 = vpop.f32.mrf.mxu0  ;;  %v701_v36 = vpop.f32.mrf.mxu1 }
 0x117   : > { %836 = vst.msk [vmem:[%s1355_s11 + $0x18] sm:$0xff] %vm833_vm0, %v771_v31  ;;  %868 = vst.msk [vmem:[%s1355_s11 + $0x118] sm:$0xff] %vm833_vm0, %v803_v32  ;;  %v772_v37 = vmax.f32 %v620_v33, 0.0  ;;  %v804_v38 = vmax.f32 %v700_v34, 0.0  ;;  %v622_v39 = vadd.f32 %v621_v35, %v1348_v6  ;;  %v702_v40 = vadd.f32 %v701_v36, %v1348_v6 }
 0x118   : > { %v623_v41 = vpop.f32.mrf.mxu0  ;;  %v703_v42 = vpop.f32.mrf.mxu1 }
 0x119   : > { %837 = vst [vmem:[%s1355_s11 + $0x20] sm:$0xff] %v772_v37  ;;  %869 = vst [vmem:[%s1355_s11 + $0x120] sm:$0xff] %v804_v38  ;;  %v773_v43 = vmax.f32 %v622_v39, 0.0  ;;  %v805_v44 = vmax.f32 %v702_v40, 0.0  ;;  %v624_v45 = vadd.f32 %v623_v41, %v1345_v5  ;;  %v704_v46 = vadd.f32 %v703_v42, %v1345_v5 }
 0x11a   : > { %v625_v47 = vpop.f32.mrf.mxu0  ;;  %v705_v48 = vpop.f32.mrf.mxu1 }
 0x11b   : > { %838 = vst.msk [vmem:[%s1355_s11 + $0x28] sm:$0xff] %vm833_vm0, %v773_v43  ;;  %870 = vst.msk [vmem:[%s1355_s11 + $0x128] sm:$0xff] %vm833_vm0, %v805_v44  ;;  %v774_v49 = vmax.f32 %v624_v45, 0.0  ;;  %v806_v50 = vmax.f32 %v704_v46, 0.0  ;;  %v626_v51 = vadd.f32 %v625_v47, %v1348_v6  ;;  %v706_v52 = vadd.f32 %v705_v48, %v1348_v6 }
 0x11c   : > { %v629_v53 = vpop.f32.mrf.mxu0  ;;  %v709_v54 = vpop.f32.mrf.mxu1 }
 0x11d   : > { %839 = vst [vmem:[%s1355_s11 + $0x30] sm:$0xff] %v774_v49  ;;  %871 = vst [vmem:[%s1355_s11 + $0x130] sm:$0xff] %v806_v50  ;;  %v775_v55 = vmax.f32 %v626_v51, 0.0  ;;  %v807_v56 = vmax.f32 %v706_v52, 0.0  ;;  %v630_v57 = vadd.f32 %v629_v53, %v1345_v5  ;;  %v710_v58 = vadd.f32 %v709_v54, %v1345_v5 }
 0x11e   : > { %v631_v59 = vpop.f32.mrf.mxu0  ;;  %v711_v60 = vpop.f32.mrf.mxu1 }
 0x11f   : > { %840 = vst.msk [vmem:[%s1355_s11 + $0x38] sm:$0xff] %vm833_vm0, %v775_v55  ;;  %872 = vst.msk [vmem:[%s1355_s11 + $0x138] sm:$0xff] %vm833_vm0, %v807_v56  ;;  %v776_v61 = vmax.f32 %v630_v57, 0.0  ;;  %v808_v62 = vmax.f32 %v710_v58, 0.0  ;;  %v632_v63 = vadd.f32 %v631_v59, %v1348_v6  ;;  %v712_v0 = vadd.f32 %v711_v60, %v1348_v6 }
 0x120   : > { %v633_v1 = vpop.f32.mrf.mxu0  ;;  %v713_v2 = vpop.f32.mrf.mxu1 }
 0x121   : > { %841 = vst [vmem:[%s1355_s11 + $0x40] sm:$0xff] %v776_v61  ;;  %873 = vst [vmem:[%s1355_s11 + $0x140] sm:$0xff] %v808_v62  ;;  %v777_v3 = vmax.f32 %v632_v63, 0.0  ;;  %v809_v4 = vmax.f32 %v712_v0, 0.0  ;;  %v634_v7 = vadd.f32 %v633_v1, %v1345_v5  ;;  %v714_v8 = vadd.f32 %v713_v2, %v1345_v5 }
 0x122   : > { %v635_v9 = vpop.f32.mrf.mxu0  ;;  %v715_v10 = vpop.f32.mrf.mxu1 }
 0x123   : > { %842 = vst.msk [vmem:[%s1355_s11 + $0x48] sm:$0xff] %vm833_vm0, %v777_v3  ;;  %874 = vst.msk [vmem:[%s1355_s11 + $0x148] sm:$0xff] %vm833_vm0, %v809_v4  ;;  %v778_v11 = vmax.f32 %v634_v7, 0.0  ;;  %v810_v12 = vmax.f32 %v714_v8, 0.0  ;;  %v636_v13 = vadd.f32 %v635_v9, %v1348_v6  ;;  %v716_v14 = vadd.f32 %v715_v10, %v1348_v6 }
 0x124   : > { %v639_v15 = vpop.f32.mrf.mxu0  ;;  %v719_v16 = vpop.f32.mrf.mxu1 }
 0x125   : > { %843 = vst [vmem:[%s1355_s11 + $0x50] sm:$0xff] %v778_v11  ;;  %875 = vst [vmem:[%s1355_s11 + $0x150] sm:$0xff] %v810_v12  ;;  %v779_v17 = vmax.f32 %v636_v13, 0.0  ;;  %v811_v18 = vmax.f32 %v716_v14, 0.0  ;;  %v640_v19 = vadd.f32 %v639_v15, %v1345_v5  ;;  %v720_v20 = vadd.f32 %v719_v16, %v1345_v5 }
 0x126   : > { %v641_v21 = vpop.f32.mrf.mxu0  ;;  %v721_v22 = vpop.f32.mrf.mxu1 }
 0x127   : > { %844 = vst.msk [vmem:[%s1355_s11 + $0x58] sm:$0xff] %vm833_vm0, %v779_v17  ;;  %876 = vst.msk [vmem:[%s1355_s11 + $0x158] sm:$0xff] %vm833_vm0, %v811_v18  ;;  %v780_v23 = vmax.f32 %v640_v19, 0.0  ;;  %v812_v24 = vmax.f32 %v720_v20, 0.0  ;;  %v642_v25 = vadd.f32 %v641_v21, %v1348_v6  ;;  %v722_v26 = vadd.f32 %v721_v22, %v1348_v6 }
 0x128   : > { %v643_v27 = vpop.f32.mrf.mxu0  ;;  %v723_v28 = vpop.f32.mrf.mxu1 }
 0x129   : > { %845 = vst [vmem:[%s1355_s11 + $0x60] sm:$0xff] %v780_v23  ;;  %877 = vst [vmem:[%s1355_s11 + $0x160] sm:$0xff] %v812_v24  ;;  %v781_v29 = vmax.f32 %v642_v25, 0.0  ;;  %v813_v30 = vmax.f32 %v722_v26, 0.0  ;;  %v644_v31 = vadd.f32 %v643_v27, %v1345_v5  ;;  %v724_v32 = vadd.f32 %v723_v28, %v1345_v5 }
 0x12a   : > { %v645_v33 = vpop.f32.mrf.mxu0  ;;  %v725_v34 = vpop.f32.mrf.mxu1 }
 0x12b   : > { %846 = vst.msk [vmem:[%s1355_s11 + $0x68] sm:$0xff] %vm833_vm0, %v781_v29  ;;  %878 = vst.msk [vmem:[%s1355_s11 + $0x168] sm:$0xff] %vm833_vm0, %v813_v30  ;;  %v782_v35 = vmax.f32 %v644_v31, 0.0  ;;  %v814_v36 = vmax.f32 %v724_v32, 0.0  ;;  %v646_v37 = vadd.f32 %v645_v33, %v1348_v6  ;;  %v726_v38 = vadd.f32 %v725_v34, %v1348_v6 }
 0x12c   : > { %v649_v39 = vpop.f32.mrf.mxu0  ;;  %v729_v40 = vpop.f32.mrf.mxu1 }
 0x12d   : > { %847 = vst [vmem:[%s1355_s11 + $0x70] sm:$0xff] %v782_v35  ;;  %879 = vst [vmem:[%s1355_s11 + $0x170] sm:$0xff] %v814_v36  ;;  %v783_v41 = vmax.f32 %v646_v37, 0.0  ;;  %v815_v42 = vmax.f32 %v726_v38, 0.0  ;;  %v650_v43 = vadd.f32 %v649_v39, %v1345_v5  ;;  %v730_v44 = vadd.f32 %v729_v40, %v1345_v5 }
 0x12e   : > { %v651_v45 = vpop.f32.mrf.mxu0  ;;  %v731_v46 = vpop.f32.mrf.mxu1 }
 0x12f   : > { %848 = vst.msk [vmem:[%s1355_s11 + $0x78] sm:$0xff] %vm833_vm0, %v783_v41  ;;  %880 = vst.msk [vmem:[%s1355_s11 + $0x178] sm:$0xff] %vm833_vm0, %v815_v42  ;;  %v784_v47 = vmax.f32 %v650_v43, 0.0  ;;  %v816_v48 = vmax.f32 %v730_v44, 0.0  ;;  %v652_v49 = vadd.f32 %v651_v45, %v1348_v6  ;;  %v732_v50 = vadd.f32 %v731_v46, %v1348_v6 }
 0x130   : > { %v653_v51 = vpop.f32.mrf.mxu0  ;;  %v733_v52 = vpop.f32.mrf.mxu1 }
 0x131   : > { %849 = vst [vmem:[%s1355_s11 + $0x80] sm:$0xff] %v784_v47  ;;  %881 = vst [vmem:[%s1355_s11 + $0x180] sm:$0xff] %v816_v48  ;;  %v785_v53 = vmax.f32 %v652_v49, 0.0  ;;  %v817_v54 = vmax.f32 %v732_v50, 0.0  ;;  %v654_v55 = vadd.f32 %v653_v51, %v1345_v5  ;;  %v734_v56 = vadd.f32 %v733_v52, %v1345_v5 }
 0x132   : > { %v655_v57 = vpop.f32.mrf.mxu0  ;;  %v735_v58 = vpop.f32.mrf.mxu1 }
 0x133   : > { %850 = vst.msk [vmem:[%s1355_s11 + $0x88] sm:$0xff] %vm833_vm0, %v785_v53  ;;  %882 = vst.msk [vmem:[%s1355_s11 + $0x188] sm:$0xff] %vm833_vm0, %v817_v54  ;;  %v786_v59 = vmax.f32 %v654_v55, 0.0  ;;  %v818_v60 = vmax.f32 %v734_v56, 0.0  ;;  %v656_v61 = vadd.f32 %v655_v57, %v1348_v6  ;;  %v736_v62 = vadd.f32 %v735_v58, %v1348_v6 }
 0x134   : > { %v659_v63 = vpop.f32.mrf.mxu0  ;;  %v739_v0 = vpop.f32.mrf.mxu1 }
 0x135   : > { %851 = vst [vmem:[%s1355_s11 + $0x90] sm:$0xff] %v786_v59  ;;  %883 = vst [vmem:[%s1355_s11 + $0x190] sm:$0xff] %v818_v60  ;;  %v787_v1 = vmax.f32 %v656_v61, 0.0  ;;  %v819_v2 = vmax.f32 %v736_v62, 0.0  ;;  %v660_v3 = vadd.f32 %v659_v63, %v1345_v5  ;;  %v740_v4 = vadd.f32 %v739_v0, %v1345_v5 }
 0x136   : > { %v661_v7 = vpop.f32.mrf.mxu0  ;;  %v741_v8 = vpop.f32.mrf.mxu1 }
 0x137   : > { %852 = vst.msk [vmem:[%s1355_s11 + $0x98] sm:$0xff] %vm833_vm0, %v787_v1  ;;  %884 = vst.msk [vmem:[%s1355_s11 + $0x198] sm:$0xff] %vm833_vm0, %v819_v2  ;;  %v788_v9 = vmax.f32 %v660_v3, 0.0  ;;  %v820_v10 = vmax.f32 %v740_v4, 0.0  ;;  %v662_v11 = vadd.f32 %v661_v7, %v1348_v6  ;;  %v742_v12 = vadd.f32 %v741_v8, %v1348_v6 }
 0x138   : > { %v663_v13 = vpop.f32.mrf.mxu0  ;;  %v743_v14 = vpop.f32.mrf.mxu1 }
 0x139   : > { %853 = vst [vmem:[%s1355_s11 + $0xa0] sm:$0xff] %v788_v9  ;;  %885 = vst [vmem:[%s1355_s11 + $0x1a0] sm:$0xff] %v820_v10  ;;  %v789_v15 = vmax.f32 %v662_v11, 0.0  ;;  %v821_v16 = vmax.f32 %v742_v12, 0.0  ;;  %v664_v17 = vadd.f32 %v663_v13, %v1345_v5  ;;  %v744_v18 = vadd.f32 %v743_v14, %v1345_v5 }
 0x13a   : > { %v665_v19 = vpop.f32.mrf.mxu0  ;;  %v745_v20 = vpop.f32.mrf.mxu1 }
 0x13b   : > { %854 = vst.msk [vmem:[%s1355_s11 + $0xa8] sm:$0xff] %vm833_vm0, %v789_v15  ;;  %886 = vst.msk [vmem:[%s1355_s11 + $0x1a8] sm:$0xff] %vm833_vm0, %v821_v16  ;;  %v790_v21 = vmax.f32 %v664_v17, 0.0  ;;  %v822_v22 = vmax.f32 %v744_v18, 0.0  ;;  %v666_v23 = vadd.f32 %v665_v19, %v1348_v6  ;;  %v746_v24 = vadd.f32 %v745_v20, %v1348_v6 }
 0x13c   : > { %v669_v25 = vpop.f32.mrf.mxu0  ;;  %v749_v26 = vpop.f32.mrf.mxu1 }
 0x13d   : > { %855 = vst [vmem:[%s1355_s11 + $0xb0] sm:$0xff] %v790_v21  ;;  %887 = vst [vmem:[%s1355_s11 + $0x1b0] sm:$0xff] %v822_v22  ;;  %v791_v27 = vmax.f32 %v666_v23, 0.0  ;;  %v823_v28 = vmax.f32 %v746_v24, 0.0  ;;  %v670_v29 = vadd.f32 %v669_v25, %v1345_v5  ;;  %v750_v30 = vadd.f32 %v749_v26, %v1345_v5 }
 0x13e   : > { %v671_v31 = vpop.f32.mrf.mxu0  ;;  %v751_v32 = vpop.f32.mrf.mxu1 }
 0x13f   : > { %856 = vst.msk [vmem:[%s1355_s11 + $0xb8] sm:$0xff] %vm833_vm0, %v791_v27  ;;  %888 = vst.msk [vmem:[%s1355_s11 + $0x1b8] sm:$0xff] %vm833_vm0, %v823_v28  ;;  %v792_v33 = vmax.f32 %v670_v29, 0.0  ;;  %v824_v34 = vmax.f32 %v750_v30, 0.0  ;;  %v672_v35 = vadd.f32 %v671_v31, %v1348_v6  ;;  %v752_v36 = vadd.f32 %v751_v32, %v1348_v6 }
 0x140   : > { %v673_v37 = vpop.f32.mrf.mxu0  ;;  %v753_v38 = vpop.f32.mrf.mxu1 }
 0x141   : > { %857 = vst [vmem:[%s1355_s11 + $0xc0] sm:$0xff] %v792_v33  ;;  %889 = vst [vmem:[%s1355_s11 + $0x1c0] sm:$0xff] %v824_v34  ;;  %v793_v39 = vmax.f32 %v672_v35, 0.0  ;;  %v825_v40 = vmax.f32 %v752_v36, 0.0  ;;  %v674_v41 = vadd.f32 %v673_v37, %v1345_v5  ;;  %v754_v42 = vadd.f32 %v753_v38, %v1345_v5 }
 0x142   : > { %v675_v43 = vpop.f32.mrf.mxu0  ;;  %v755_v44 = vpop.f32.mrf.mxu1 }
 0x143   : > { %858 = vst.msk [vmem:[%s1355_s11 + $0xc8] sm:$0xff] %vm833_vm0, %v793_v39  ;;  %890 = vst.msk [vmem:[%s1355_s11 + $0x1c8] sm:$0xff] %vm833_vm0, %v825_v40  ;;  %v794_v45 = vmax.f32 %v674_v41, 0.0  ;;  %v826_v46 = vmax.f32 %v754_v42, 0.0  ;;  %v676_v47 = vadd.f32 %v675_v43, %v1348_v6  ;;  %v756_v48 = vadd.f32 %v755_v44, %v1348_v6 }
 0x144   : > { %v679_v49 = vpop.f32.mrf.mxu0  ;;  %v759_v50 = vpop.f32.mrf.mxu1 }
 0x145   : > { %859 = vst [vmem:[%s1355_s11 + $0xd0] sm:$0xff] %v794_v45  ;;  %891 = vst [vmem:[%s1355_s11 + $0x1d0] sm:$0xff] %v826_v46  ;;  %v795_v51 = vmax.f32 %v676_v47, 0.0  ;;  %v827_v52 = vmax.f32 %v756_v48, 0.0  ;;  %v680_v53 = vadd.f32 %v679_v49, %v1345_v5  ;;  %v760_v54 = vadd.f32 %v759_v50, %v1345_v5 }
 0x146   : > { %v681_v55 = vpop.f32.mrf.mxu0  ;;  %v761_v56 = vpop.f32.mrf.mxu1 }
 0x147   : > { %860 = vst.msk [vmem:[%s1355_s11 + $0xd8] sm:$0xff] %vm833_vm0, %v795_v51  ;;  %892 = vst.msk [vmem:[%s1355_s11 + $0x1d8] sm:$0xff] %vm833_vm0, %v827_v52  ;;  %v796_v57 = vmax.f32 %v680_v53, 0.0  ;;  %v828_v58 = vmax.f32 %v760_v54, 0.0  ;;  %v682_v59 = vadd.f32 %v681_v55, %v1348_v6  ;;  %v762_v60 = vadd.f32 %v761_v56, %v1348_v6 }
 0x148   : > { %v683_v61 = vpop.f32.mrf.mxu0  ;;  %v763_v62 = vpop.f32.mrf.mxu1 }
 0x149   : > { %861 = vst [vmem:[%s1355_s11 + $0xe0] sm:$0xff] %v796_v57  ;;  %893 = vst [vmem:[%s1355_s11 + $0x1e0] sm:$0xff] %v828_v58  ;;  %v797_v63 = vmax.f32 %v682_v59, 0.0  ;;  %v829_v0 = vmax.f32 %v762_v60, 0.0  ;;  %v684_v1 = vadd.f32 %v683_v61, %v1345_v5  ;;  %v764_v2 = vadd.f32 %v763_v62, %v1345_v5 }
 0x14a   : > { %v685_v3 = vpop.f32.mrf.mxu0  ;;  %v765_v4 = vpop.f32.mrf.mxu1 }
 0x14b   : > { %862 = vst.msk [vmem:[%s1355_s11 + $0xe8] sm:$0xff] %vm833_vm0, %v797_v63  ;;  %894 = vst.msk [vmem:[%s1355_s11 + $0x1e8] sm:$0xff] %vm833_vm0, %v829_v0  ;;  %v798_v7 = vmax.f32 %v684_v1, 0.0  ;;  %v830_v8 = vmax.f32 %v764_v2, 0.0  ;;  %v686_v9 = vadd.f32 %v685_v3, %v1348_v6  ;;  %v766_v10 = vadd.f32 %v765_v4, %v1348_v6 }
 0x14d   : > { %863 = vst [vmem:[%s1355_s11 + $0xf0] sm:$0xff] %v798_v7  ;;  %895 = vst [vmem:[%s1355_s11 + $0x1f0] sm:$0xff] %v830_v8  ;;  %v799_v11 = vmax.f32 %v686_v9, 0.0  ;;  %v831_v12 = vmax.f32 %v766_v10, 0.0 }
 0x14f   : > { %864 = vst.msk [vmem:[%s1355_s11 + $0xf8] sm:$0xff] %vm833_vm0, %v799_v11  ;;  %896 = vst.msk [vmem:[%s1355_s11 + $0x1f8] sm:$0xff] %vm833_vm0, %v831_v12 }
 0x150 PF: > { %s13_s12 = sadd.s32 1, %s1176_s12  }
 0x151   : > { %p10_p4 = scmp.ge.s32.totalorder %s13_s12, 4  }
 0x153   :  { %12 = sbr.rel (!%p10_p4) target bundleno = 1 (0x1), region = 62 }

// kernel: inception4e_forward.4
= control target key start
LH: loop header
LB: loop body
LE: loop exit
PB: predicated region body
PF: predicated region fallthrough
CT: control target
= control target key end

     0   :  { %s948_s12 = smov 0   ;;  %s1152_s0 = inlined_call_operand.vmem [shape: bf16[512,144], index: 0, kind: input, shape index: {}]   ;;  %s1153_s1 = inlined_call_operand.vmem [shape: bf16[144,32], index: 1, kind: input, shape index: {}]   ;;  %s1154_s2 = inlined_call_operand.vmem [shape: f32[1,32], index: 2, kind: input, shape index: {}]   ;;  %s1155_s3 = inlined_call_operand.vmem [shape: f32[512,32], index: 3, kind: output, shape index: {}]  }
   0x1 LB: > { %s764_s13 = sadd.s32 4294967295, %s925_s12   ;;  %p768_p0 = scmp.ge.s32.totalorder %s925_s12, 1  ;;  %s925_s12 = sphi %s948_s12, %s13_s12  }
   0x2   : > { %p139_p1 = scmp.lt.s32.totalorder %s925_s12, 3 }
   0x4   : > { %p140_p2 = pnand %p768_p0, %p139_p1 }
   0x5   : > { %s769_s16 = sshll.u32 (!%p140_p2), %s764_s13, 5 }
   0x6   : > { %143 = sbr.rel (%p140_p2) target bundleno = 306 (0x132), region = 32  ;;  %p165_p3 = scmp.lt.s32.totalorder (!%p140_p2), %s769_s16, 63 }
   0xb   : > { %v862_v0 = vld [vmem:[%s1153_s1 + $0x38] sm:$0xff]   ;;  %v927_v1 = vmov 0   ;;  %v863_v2 = vld [vmem:[%s1153_s1 + $0x30] sm:$0xff]   ;;  %s1157_s16 = smov (!%p165_p3, %s769_s16), 63  ;;  %v864_v3 = vld [vmem:[%s1153_s1 + $0x28] sm:$0xff]   ;;  %vm433_vm0 = vcmask 130048  }
   0xc   : > { %482 = vmatprep.subr.bf16.mxu0 %v927_v1  ;;  %835 = vmatprep.subr.bf16.mxu1 %v927_v1  ;;  %s834_s21 = sshll.u32 %s1157_s16, 3  ;;  %v865_v4 = vld [vmem:[%s1153_s1 + $0x20] sm:$0xff]   ;;  %v866_v7 = vld [vmem:[%s1153_s1 + $0x18] sm:$0xff]   ;;  %v867_v8 = vld [vmem:[%s1153_s1 + $0x10] sm:$0xff]   ;;  %vm675_vm1 = vcmask 261120  }
   0xd   : > { %483 = vmatpush1.bf16.msra.mxu0 %v862_v0  ;;  %844 = vmatpush1.bf16.msra.mxu1 %v862_v0  ;;  %s973_s24 = scalar_lea.vmem %s1152_s0, %s834_s21  ;;  %v868_v9 = vld [vmem:[%s1153_s1 + $0x8] sm:$0xff]   ;;  %v869_v10 = vld [vmem:[%s1153_s1] sm:$0xff]   ;;  %s1053_s15 = scalar_lea.vmem %s1155_s3, %s834_s21 }
   0xe   : > { %484 = vmatprep.subr.bf16.mxu0 %v927_v1  ;;  %836 = vmatprep.subr.bf16.mxu1 %v927_v1  ;;  %v873_v5 = vld [vmem:[%s973_s24 + $0x4] ss:$8 sps:$4 sm:$0xff]   ;;  %v871_v12 = vld [vmem:[%s973_s24] ss:$8 sps:$4 sm:$0xff]   ;;  %v877_v14 = vld [vmem:[%s973_s24 + $0x14] ss:$8 sps:$4 sm:$0xff]  }
   0xf   : > { %v876_v6 = vld [vmem:[%s973_s24 + $0x84] ss:$8 sps:$4 sm:$0xff]   ;;  %816 = vmatprep.mubr.msk.bf16.mxu0 %vm433_vm0, %v873_v5  ;;  %v874_v13 = vld [vmem:[%s973_s24 + $0x80] ss:$8 sps:$4 sm:$0xff]   ;;  %v879_v15 = vld [vmem:[%s973_s24 + $0x94] ss:$8 sps:$4 sm:$0xff]  }
  0x10   : > { %824 = vmatprep.mubr.msk.bf16.mxu1 %vm433_vm0, %v876_v6  ;;  %v870_v11 = vld [vmem:[%s1153_s1 + $0x40] sm:$0xff]   ;;  %v881_v16 = vld [vmem:[%s973_s24 + $0x10] ss:$8 sps:$4 sm:$0xff]   ;;  %v889_v22 = vld [vmem:[%s973_s24 + $0x34] ss:$8 sps:$4 sm:$0xff]  }
  0x11   : > { %485 = vmatpush1.bf16.msra.mxu0 %v863_v2  ;;  %845 = vmatpush1.bf16.msra.mxu1 %v863_v2  ;;  %v882_v17 = vld [vmem:[%s973_s24 + $0x90] ss:$8 sps:$4 sm:$0xff]   ;;  %v883_v18 = vld [vmem:[%s973_s24 + $0x24] ss:$8 sps:$4 sm:$0xff]   ;;  %v887_v20 = vld [vmem:[%s973_s24 + $0x20] ss:$8 sps:$4 sm:$0xff]  }
  0x12   : > { %486 = vmatprep.subr.bf16.mxu0 %v927_v1  ;;  %837 = vmatprep.subr.bf16.mxu1 %v927_v1  ;;  %v885_v19 = vld [vmem:[%s973_s24 + $0xa4] ss:$8 sps:$4 sm:$0xff]   ;;  %v888_v21 = vld [vmem:[%s973_s24 + $0xa0] ss:$8 sps:$4 sm:$0xff]   ;;  %v891_v23 = vld [vmem:[%s973_s24 + $0xb4] ss:$8 sps:$4 sm:$0xff]  }
  0x13   : > { %v893_v24 = vld [vmem:[%s973_s24 + $0x30] ss:$8 sps:$4 sm:$0xff]   ;;  %v895_v26 = vld [vmem:[%s973_s24 + $0x44] ss:$8 sps:$4 sm:$0xff]   ;;  %v899_v28 = vld [vmem:[%s973_s24 + $0x40] ss:$8 sps:$4 sm:$0xff]  }
  0x14   : > { %v894_v25 = vld [vmem:[%s973_s24 + $0xb0] ss:$8 sps:$4 sm:$0xff]   ;;  %v897_v27 = vld [vmem:[%s973_s24 + $0xc4] ss:$8 sps:$4 sm:$0xff]   ;;  %v900_v29 = vld [vmem:[%s973_s24 + $0xc0] ss:$8 sps:$4 sm:$0xff]  }
  0x15   : > { %487 = vmatpush1.bf16.msra.mxu0 %v864_v3  ;;  %846 = vmatpush1.bf16.msra.mxu1 %v864_v3  ;;  %v901_v30 = vld [vmem:[%s973_s24 + $0x54] ss:$8 sps:$4 sm:$0xff]   ;;  %v905_v32 = vld [vmem:[%s973_s24 + $0x50] ss:$8 sps:$4 sm:$0xff]   ;;  %v907_v34 = vld [vmem:[%s973_s24 + $0x64] ss:$8 sps:$4 sm:$0xff]  }
  0x16   : > { %488 = vmatprep.subr.bf16.mxu0 %v927_v1  ;;  %838 = vmatprep.subr.bf16.mxu1 %v927_v1  ;;  %v903_v31 = vld [vmem:[%s973_s24 + $0xd4] ss:$8 sps:$4 sm:$0xff]   ;;  %v906_v33 = vld [vmem:[%s973_s24 + $0xd0] ss:$8 sps:$4 sm:$0xff]   ;;  %v909_v35 = vld [vmem:[%s973_s24 + $0xe4] ss:$8 sps:$4 sm:$0xff]  }
  0x17   : > { %v911_v36 = vld [vmem:[%s973_s24 + $0x60] ss:$8 sps:$4 sm:$0xff]   ;;  %v913_v38 = vld [vmem:[%s973_s24 + $0x74] ss:$8 sps:$4 sm:$0xff]   ;;  %v917_v40 = vld [vmem:[%s973_s24 + $0x70] ss:$8 sps:$4 sm:$0xff]  }
  0x18   : > { %v912_v37 = vld [vmem:[%s973_s24 + $0xe0] ss:$8 sps:$4 sm:$0xff]   ;;  %v915_v39 = vld [vmem:[%s973_s24 + $0xf4] ss:$8 sps:$4 sm:$0xff]   ;;  %v918_v41 = vld [vmem:[%s973_s24 + $0xf0] ss:$8 sps:$4 sm:$0xff]  }
  0x19   : > { %489 = vmatpush1.bf16.msra.mxu0 %v865_v4  ;;  %847 = vmatpush1.bf16.msra.mxu1 %v865_v4  ;;  %v1044_v42 = vld [vmem:[%s1154_s2] ss:$0 sm:$0xff] }
  0x1a   : > { %490 = vmatprep.subr.bf16.mxu0 %v927_v1  ;;  %839 = vmatprep.subr.bf16.mxu1 %v927_v1 }
  0x1d   : > { %491 = vmatpush1.bf16.msra.mxu0 %v866_v7  ;;  %848 = vmatpush1.bf16.msra.mxu1 %v866_v7 }
  0x1e   : > { %492 = vmatprep.subr.bf16.mxu0 %v927_v1  ;;  %840 = vmatprep.subr.bf16.mxu1 %v927_v1 }
  0x21   : > { %493 = vmatpush1.bf16.msra.mxu0 %v867_v8  ;;  %849 = vmatpush1.bf16.msra.mxu1 %v867_v8 }
  0x22   : > { %494 = vmatprep.subr.bf16.mxu0 %v927_v1  ;;  %841 = vmatprep.subr.bf16.mxu1 %v927_v1 }
  0x25   : > { %495 = vmatpush1.bf16.msra.mxu0 %v868_v9  ;;  %850 = vmatpush1.bf16.msra.mxu1 %v868_v9 }
  0x26   : > { %496 = vmatprep.subr.bf16.mxu0 %v927_v1  ;;  %842 = vmatprep.subr.bf16.mxu1 %v927_v1 }
  0x29   : > { %497 = vmatpush1.bf16.msra.mxu0 %v869_v10  ;;  %851 = vmatpush1.bf16.msra.mxu1 %v869_v10 }
  0x2a   : > { %512 = vmatprep.subr.bf16.mxu0 %v927_v1  ;;  %843 = vmatprep.subr.bf16.mxu1 %v927_v1 }
  0x2d   : > { %513 = vmatpush2.bf16.msra.mxu0 %v870_v11  ;;  %852 = vmatpush2.bf16.msra.mxu1 %v870_v11 }
  0x30   : > { %515 = vmatmul.mubr.bf16.vlgmr.msra.gmra.mxu0 %v871_v12  ;;  %579 = vmatmul.mubr.bf16.vlgmr.msra.gmra.mxu1 %v874_v13 }
  0x31   : > { %817 = vmatprep.mubr.msk.bf16.mxu0 %vm433_vm0, %v877_v14  ;;  %825 = vmatprep.mubr.msk.bf16.mxu1 %vm433_vm0, %v879_v15 }
  0x38   : > { %523 = vmatmul.mubr.bf16.gmra.mxu0 %v881_v16  ;;  %587 = vmatmul.mubr.bf16.gmra.mxu1 %v882_v17 }
  0x39   : > { %818 = vmatprep.mubr.msk.bf16.mxu0 %vm433_vm0, %v883_v18  ;;  %826 = vmatprep.mubr.msk.bf16.mxu1 %vm433_vm0, %v885_v19 }
  0x40   : > { %531 = vmatmul.mubr.bf16.gmra.mxu0 %v887_v20  ;;  %595 = vmatmul.mubr.bf16.gmra.mxu1 %v888_v21 }
  0x41   : > { %819 = vmatprep.mubr.msk.bf16.mxu0 %vm433_vm0, %v889_v22  ;;  %827 = vmatprep.mubr.msk.bf16.mxu1 %vm433_vm0, %v891_v23 }
  0x48   : > { %539 = vmatmul.mubr.bf16.gmra.mxu0 %v893_v24  ;;  %603 = vmatmul.mubr.bf16.gmra.mxu1 %v894_v25 }
  0x49   : > { %820 = vmatprep.mubr.msk.bf16.mxu0 %vm433_vm0, %v895_v26  ;;  %828 = vmatprep.mubr.msk.bf16.mxu1 %vm433_vm0, %v897_v27 }
  0x50   : > { %547 = vmatmul.mubr.bf16.gmra.mxu0 %v899_v28  ;;  %611 = vmatmul.mubr.bf16.gmra.mxu1 %v900_v29 }
  0x51   : > { %821 = vmatprep.mubr.msk.bf16.mxu0 %vm433_vm0, %v901_v30  ;;  %829 = vmatprep.mubr.msk.bf16.mxu1 %vm433_vm0, %v903_v31 }
  0x58   : > { %555 = vmatmul.mubr.bf16.gmra.mxu0 %v905_v32  ;;  %619 = vmatmul.mubr.bf16.gmra.mxu1 %v906_v33 }
  0x59   : > { %822 = vmatprep.mubr.msk.bf16.mxu0 %vm433_vm0, %v907_v34  ;;  %830 = vmatprep.mubr.msk.bf16.mxu1 %vm433_vm0, %v909_v35 }
  0x60   : > { %563 = vmatmul.mubr.bf16.gmra.mxu0 %v911_v36  ;;  %627 = vmatmul.mubr.bf16.gmra.mxu1 %v912_v37 }
  0x61   : > { %823 = vmatprep.mubr.msk.bf16.mxu0 %vm433_vm0, %v913_v38  ;;  %831 = vmatprep.mubr.msk.bf16.mxu1 %vm433_vm0, %v915_v39 }
  0x68   : > { %571 = vmatmul.mubr.bf16.gmra.mxu0 %v917_v40  ;;  %635 = vmatmul.mubr.bf16.gmra.mxu1 %v918_v41 }
  0xf0   : > { %v516_v43 = vpop.f32.mrf.mxu0  ;;  %v580_v44 = vpop.f32.mrf.mxu1 }
  0xf1   : > { %v517_v45 = vadd.f32 %v1044_v42, %v516_v43  ;;  %v581_v46 = vadd.f32 %v1044_v42, %v580_v44 }
  0xf2   : > { %v518_v47 = vpop.f32.mrf.mxu0  ;;  %v582_v48 = vpop.f32.mrf.mxu1 }
  0xf3   : > { %v643_v49 = vmax.f32 %v517_v45, 0.0  ;;  %v659_v50 = vmax.f32 %v581_v46, 0.0 }
  0xf4   : > { %v519_v51 = vpop.f32.mrf.mxu0  ;;  %v583_v52 = vpop.f32.mrf.mxu1 }
  0xf5   : > { %676 = vst.msk [vmem:[%s1053_s15] sm:$0xff] %vm675_vm1, %v643_v49  ;;  %692 = vst.msk [vmem:[%s1053_s15 + $0x80] sm:$0xff] %vm675_vm1, %v659_v50  ;;  %v520_v53 = vadd.f32 %v1044_v42, %v519_v51  ;;  %v584_v54 = vadd.f32 %v1044_v42, %v583_v52 }
  0xf6   : > { %v521_v55 = vpop.f32.mrf.mxu0  ;;  %v585_v56 = vpop.f32.mrf.mxu1 }
  0xf7   : > { %v644_v57 = vmax.f32 %v520_v53, 0.0  ;;  %v660_v58 = vmax.f32 %v584_v54, 0.0 }
  0xf8   : > { %v524_v59 = vpop.f32.mrf.mxu0  ;;  %v588_v60 = vpop.f32.mrf.mxu1 }
  0xf9   : > { %677 = vst.msk [vmem:[%s1053_s15 + $0x8] sm:$0xff] %vm675_vm1, %v644_v57  ;;  %693 = vst.msk [vmem:[%s1053_s15 + $0x88] sm:$0xff] %vm675_vm1, %v660_v58  ;;  %v525_v61 = vadd.f32 %v1044_v42, %v524_v59  ;;  %v589_v62 = vadd.f32 %v1044_v42, %v588_v60 }
  0xfa   : > { %v526_v63 = vpop.f32.mrf.mxu0  ;;  %v590_v0 = vpop.f32.mrf.mxu1 }
  0xfb   : > { %v645_v1 = vmax.f32 %v525_v61, 0.0  ;;  %v661_v2 = vmax.f32 %v589_v62, 0.0 }
  0xfc   : > { %v527_v3 = vpop.f32.mrf.mxu0  ;;  %v591_v4 = vpop.f32.mrf.mxu1 }
  0xfd   : > { %678 = vst.msk [vmem:[%s1053_s15 + $0x10] sm:$0xff] %vm675_vm1, %v645_v1  ;;  %694 = vst.msk [vmem:[%s1053_s15 + $0x90] sm:$0xff] %vm675_vm1, %v661_v2  ;;  %v528_v5 = vadd.f32 %v1044_v42, %v527_v3  ;;  %v592_v6 = vadd.f32 %v1044_v42, %v591_v4 }
  0xfe   : > { %v529_v7 = vpop.f32.mrf.mxu0  ;;  %v593_v8 = vpop.f32.mrf.mxu1 }
  0xff   : > { %v646_v9 = vmax.f32 %v528_v5, 0.0  ;;  %v662_v10 = vmax.f32 %v592_v6, 0.0 }
 0x100   : > { %v532_v11 = vpop.f32.mrf.mxu0  ;;  %v596_v12 = vpop.f32.mrf.mxu1 }
 0x101   : > { %679 = vst.msk [vmem:[%s1053_s15 + $0x18] sm:$0xff] %vm675_vm1, %v646_v9  ;;  %695 = vst.msk [vmem:[%s1053_s15 + $0x98] sm:$0xff] %vm675_vm1, %v662_v10  ;;  %v533_v13 = vadd.f32 %v1044_v42, %v532_v11  ;;  %v597_v14 = vadd.f32 %v1044_v42, %v596_v12 }
 0x102   : > { %v534_v15 = vpop.f32.mrf.mxu0  ;;  %v598_v16 = vpop.f32.mrf.mxu1 }
 0x103   : > { %v647_v17 = vmax.f32 %v533_v13, 0.0  ;;  %v663_v18 = vmax.f32 %v597_v14, 0.0 }
 0x104   : > { %v535_v19 = vpop.f32.mrf.mxu0  ;;  %v599_v20 = vpop.f32.mrf.mxu1 }
 0x105   : > { %680 = vst.msk [vmem:[%s1053_s15 + $0x20] sm:$0xff] %vm675_vm1, %v647_v17  ;;  %696 = vst.msk [vmem:[%s1053_s15 + $0xa0] sm:$0xff] %vm675_vm1, %v663_v18  ;;  %v536_v21 = vadd.f32 %v1044_v42, %v535_v19  ;;  %v600_v22 = vadd.f32 %v1044_v42, %v599_v20 }
 0x106   : > { %v537_v23 = vpop.f32.mrf.mxu0  ;;  %v601_v24 = vpop.f32.mrf.mxu1 }
 0x107   : > { %v648_v25 = vmax.f32 %v536_v21, 0.0  ;;  %v664_v26 = vmax.f32 %v600_v22, 0.0 }
 0x108   : > { %v540_v27 = vpop.f32.mrf.mxu0  ;;  %v604_v28 = vpop.f32.mrf.mxu1 }
 0x109   : > { %681 = vst.msk [vmem:[%s1053_s15 + $0x28] sm:$0xff] %vm675_vm1, %v648_v25  ;;  %697 = vst.msk [vmem:[%s1053_s15 + $0xa8] sm:$0xff] %vm675_vm1, %v664_v26  ;;  %v541_v29 = vadd.f32 %v1044_v42, %v540_v27  ;;  %v605_v30 = vadd.f32 %v1044_v42, %v604_v28 }
 0x10a   : > { %v542_v31 = vpop.f32.mrf.mxu0  ;;  %v606_v32 = vpop.f32.mrf.mxu1 }
 0x10b   : > { %v649_v33 = vmax.f32 %v541_v29, 0.0  ;;  %v665_v34 = vmax.f32 %v605_v30, 0.0 }
 0x10c   : > { %v543_v35 = vpop.f32.mrf.mxu0  ;;  %v607_v36 = vpop.f32.mrf.mxu1 }
 0x10d   : > { %682 = vst.msk [vmem:[%s1053_s15 + $0x30] sm:$0xff] %vm675_vm1, %v649_v33  ;;  %698 = vst.msk [vmem:[%s1053_s15 + $0xb0] sm:$0xff] %vm675_vm1, %v665_v34  ;;  %v544_v37 = vadd.f32 %v1044_v42, %v543_v35  ;;  %v608_v38 = vadd.f32 %v1044_v42, %v607_v36 }
 0x10e   : > { %v545_v39 = vpop.f32.mrf.mxu0  ;;  %v609_v40 = vpop.f32.mrf.mxu1 }
 0x10f   : > { %v650_v41 = vmax.f32 %v544_v37, 0.0  ;;  %v666_v43 = vmax.f32 %v608_v38, 0.0 }
 0x110   : > { %v548_v44 = vpop.f32.mrf.mxu0  ;;  %v612_v45 = vpop.f32.mrf.mxu1 }
 0x111   : > { %683 = vst.msk [vmem:[%s1053_s15 + $0x38] sm:$0xff] %vm675_vm1, %v650_v41  ;;  %699 = vst.msk [vmem:[%s1053_s15 + $0xb8] sm:$0xff] %vm675_vm1, %v666_v43  ;;  %v549_v46 = vadd.f32 %v1044_v42, %v548_v44  ;;  %v613_v47 = vadd.f32 %v1044_v42, %v612_v45 }
 0x112   : > { %v550_v48 = vpop.f32.mrf.mxu0  ;;  %v614_v49 = vpop.f32.mrf.mxu1 }
 0x113   : > { %v651_v50 = vmax.f32 %v549_v46, 0.0  ;;  %v667_v51 = vmax.f32 %v613_v47, 0.0 }
 0x114   : > { %v551_v52 = vpop.f32.mrf.mxu0  ;;  %v615_v53 = vpop.f32.mrf.mxu1 }
 0x115   : > { %684 = vst.msk [vmem:[%s1053_s15 + $0x40] sm:$0xff] %vm675_vm1, %v651_v50  ;;  %700 = vst.msk [vmem:[%s1053_s15 + $0xc0] sm:$0xff] %vm675_vm1, %v667_v51  ;;  %v552_v54 = vadd.f32 %v1044_v42, %v551_v52  ;;  %v616_v55 = vadd.f32 %v1044_v42, %v615_v53 }
 0x116   : > { %v553_v56 = vpop.f32.mrf.mxu0  ;;  %v617_v57 = vpop.f32.mrf.mxu1 }
 0x117   : > { %v652_v58 = vmax.f32 %v552_v54, 0.0  ;;  %v668_v59 = vmax.f32 %v616_v55, 0.0 }
 0x118   : > { %v556_v60 = vpop.f32.mrf.mxu0  ;;  %v620_v61 = vpop.f32.mrf.mxu1 }
 0x119   : > { %685 = vst.msk [vmem:[%s1053_s15 + $0x48] sm:$0xff] %vm675_vm1, %v652_v58  ;;  %701 = vst.msk [vmem:[%s1053_s15 + $0xc8] sm:$0xff] %vm675_vm1, %v668_v59  ;;  %v557_v62 = vadd.f32 %v1044_v42, %v556_v60  ;;  %v621_v63 = vadd.f32 %v1044_v42, %v620_v61 }
 0x11a   : > { %v558_v0 = vpop.f32.mrf.mxu0  ;;  %v622_v1 = vpop.f32.mrf.mxu1 }
 0x11b   : > { %v653_v2 = vmax.f32 %v557_v62, 0.0  ;;  %v669_v3 = vmax.f32 %v621_v63, 0.0 }
 0x11c   : > { %v559_v4 = vpop.f32.mrf.mxu0  ;;  %v623_v5 = vpop.f32.mrf.mxu1 }
 0x11d   : > { %686 = vst.msk [vmem:[%s1053_s15 + $0x50] sm:$0xff] %vm675_vm1, %v653_v2  ;;  %702 = vst.msk [vmem:[%s1053_s15 + $0xd0] sm:$0xff] %vm675_vm1, %v669_v3  ;;  %v560_v6 = vadd.f32 %v1044_v42, %v559_v4  ;;  %v624_v7 = vadd.f32 %v1044_v42, %v623_v5 }
 0x11e   : > { %v561_v8 = vpop.f32.mrf.mxu0  ;;  %v625_v9 = vpop.f32.mrf.mxu1 }
 0x11f   : > { %v654_v10 = vmax.f32 %v560_v6, 0.0  ;;  %v670_v11 = vmax.f32 %v624_v7, 0.0 }
 0x120   : > { %v564_v12 = vpop.f32.mrf.mxu0  ;;  %v628_v13 = vpop.f32.mrf.mxu1 }
 0x121   : > { %687 = vst.msk [vmem:[%s1053_s15 + $0x58] sm:$0xff] %vm675_vm1, %v654_v10  ;;  %703 = vst.msk [vmem:[%s1053_s15 + $0xd8] sm:$0xff] %vm675_vm1, %v670_v11  ;;  %v565_v14 = vadd.f32 %v1044_v42, %v564_v12  ;;  %v629_v15 = vadd.f32 %v1044_v42, %v628_v13 }
 0x122   : > { %v566_v16 = vpop.f32.mrf.mxu0  ;;  %v630_v17 = vpop.f32.mrf.mxu1 }
 0x123   : > { %v655_v18 = vmax.f32 %v565_v14, 0.0  ;;  %v671_v19 = vmax.f32 %v629_v15, 0.0 }
 0x124   : > { %v567_v20 = vpop.f32.mrf.mxu0  ;;  %v631_v21 = vpop.f32.mrf.mxu1 }
 0x125   : > { %688 = vst.msk [vmem:[%s1053_s15 + $0x60] sm:$0xff] %vm675_vm1, %v655_v18  ;;  %704 = vst.msk [vmem:[%s1053_s15 + $0xe0] sm:$0xff] %vm675_vm1, %v671_v19  ;;  %v568_v22 = vadd.f32 %v1044_v42, %v567_v20  ;;  %v632_v23 = vadd.f32 %v1044_v42, %v631_v21 }
 0x126   : > { %v569_v24 = vpop.f32.mrf.mxu0  ;;  %v633_v25 = vpop.f32.mrf.mxu1 }
 0x127   : > { %v656_v26 = vmax.f32 %v568_v22, 0.0  ;;  %v672_v27 = vmax.f32 %v632_v23, 0.0 }
 0x128   : > { %v572_v28 = vpop.f32.mrf.mxu0  ;;  %v636_v29 = vpop.f32.mrf.mxu1 }
 0x129   : > { %689 = vst.msk [vmem:[%s1053_s15 + $0x68] sm:$0xff] %vm675_vm1, %v656_v26  ;;  %705 = vst.msk [vmem:[%s1053_s15 + $0xe8] sm:$0xff] %vm675_vm1, %v672_v27  ;;  %v573_v30 = vadd.f32 %v1044_v42, %v572_v28  ;;  %v637_v31 = vadd.f32 %v1044_v42, %v636_v29 }
 0x12a   : > { %v574_v32 = vpop.f32.mrf.mxu0  ;;  %v638_v33 = vpop.f32.mrf.mxu1 }
 0x12b   : > { %v657_v34 = vmax.f32 %v573_v30, 0.0  ;;  %v673_v35 = vmax.f32 %v637_v31, 0.0 }
 0x12c   : > { %v575_v36 = vpop.f32.mrf.mxu0  ;;  %v639_v37 = vpop.f32.mrf.mxu1 }
 0x12d   : > { %690 = vst.msk [vmem:[%s1053_s15 + $0x70] sm:$0xff] %vm675_vm1, %v657_v34  ;;  %706 = vst.msk [vmem:[%s1053_s15 + $0xf0] sm:$0xff] %vm675_vm1, %v673_v35  ;;  %v576_v38 = vadd.f32 %v1044_v42, %v575_v36  ;;  %v640_v39 = vadd.f32 %v1044_v42, %v639_v37 }
 0x12e   : > { %v577_v40 = vpop.f32.mrf.mxu0  ;;  %v641_v41 = vpop.f32.mrf.mxu1 }
 0x12f   : > { %v658_v43 = vmax.f32 %v576_v38, 0.0  ;;  %v674_v44 = vmax.f32 %v640_v39, 0.0 }
 0x131   : > { %691 = vst.msk [vmem:[%s1053_s15 + $0x78] sm:$0xff] %vm675_vm1, %v658_v43  ;;  %707 = vst.msk [vmem:[%s1053_s15 + $0xf8] sm:$0xff] %vm675_vm1, %v674_v44 }
 0x132 PF: > { %s13_s12 = sadd.s32 1, %s925_s12  }
 0x133   : > { %p10_p4 = scmp.ge.s32.totalorder %s13_s12, 4  }
 0x135   :  { %12 = sbr.rel (!%p10_p4) target bundleno = 1 (0x1), region = 62 }

// kernel: inception4e_forward.5
= control target key start
LH: loop header
LB: loop body
LE: loop exit
PB: predicated region body
PF: predicated region fallthrough
CT: control target
= control target key end

     0   :  { %s2250_s12 = smov 0   ;;  %s2788_s0 = inlined_call_operand.vmem [shape: bf16[512,576], index: 0, kind: input, shape index: {}]   ;;  %s2789_s1 = inlined_call_operand.vmem [shape: bf16[576,128], index: 1, kind: input, shape index: {}]   ;;  %s2790_s2 = inlined_call_operand.vmem [shape: f32[1,128], index: 2, kind: input, shape index: {}]   ;;  %s2791_s3 = inlined_call_operand.vmem [shape: f32[512,128], index: 3, kind: output, shape index: {}]  }
   0x1 LB: > { %s1621_s13 = sadd.s32 4294967295, %s2228_s12   ;;  %p1625_p0 = scmp.ge.s32.totalorder %s2228_s12, 1  ;;  %s2228_s12 = sphi %s2250_s12, %s13_s12  }
   0x2   : > { %p139_p1 = scmp.lt.s32.totalorder %s2228_s12, 3 }
   0x4   : > { %p140_p2 = pnand %p1625_p0, %p139_p1 }
   0x6   : > { %143 = sbr.rel (%p140_p2) target bundleno = 404 (0x194), region = 32 }
   0xb   : > { %v2074_v0 = vld [vmem:[%s2789_s1 + $0x78] sm:$0xff]   ;;  %s1626_s16 = sshll.u32 %s1621_s13, 5  ;;  %v2076_v2 = vld [vmem:[%s2789_s1 + $0x70] sm:$0xff]   ;;  %v2078_v4 = vld [vmem:[%s2789_s1 + $0x68] sm:$0xff]   ;;  %vm969_vm0 = vcmask 523264  }
   0xc   : > { %v2075_v1 = vld [vmem:[%s2789_s1 + $0x38] sm:$0xff]   ;;  %1765 = vmatprep.subr.bf16.mxu0 %v2074_v0  ;;  %2049 = vmatprep.subr.bf16.mxu1 %v2074_v0  ;;  %p165_p3 = scmp.lt.s32.totalorder %s1626_s16, 63  ;;  %v2077_v3 = vld [vmem:[%s2789_s1 + $0x30] sm:$0xff]   ;;  %v2079_v5 = vld [vmem:[%s2789_s1 + $0x28] sm:$0xff]  }
   0xd   : > { %1766 = vmatpush3.bf16.msra.mxu0 %v2075_v1  ;;  %2057 = vmatpush3.bf16.msra.mxu1 %v2075_v1  ;;  %v2080_v6 = vld [vmem:[%s2789_s1 + $0x60] sm:$0xff]   ;;  %v2082_v8 = vld [vmem:[%s2789_s1 + $0x58] sm:$0xff]   ;;  %v2084_v10 = vld [vmem:[%s2789_s1 + $0x50] sm:$0xff]  }
   0xe   : > { %1767 = vmatprep.subr.bf16.mxu0 %v2076_v2  ;;  %2050 = vmatprep.subr.bf16.mxu1 %v2076_v2  ;;  %s2831_s16 = smov (!%p165_p3, %s1626_s16), 63  ;;  %v2081_v7 = vld [vmem:[%s2789_s1 + $0x20] sm:$0xff]   ;;  %v2083_v9 = vld [vmem:[%s2789_s1 + $0x18] sm:$0xff]   ;;  %v2085_v13 = vld [vmem:[%s2789_s1 + $0x10] sm:$0xff]  }
   0xf   : > { %s2065_s29 = smul.u32 20, %s2831_s16  ;;  %v2086_v14 = vld [vmem:[%s2789_s1 + $0x48] sm:$0xff]   ;;  %v2088_v16 = vld [vmem:[%s2789_s1 + $0x40] sm:$0xff]   ;;  %v2096_v18 = vld [vmem:[%s2789_s1 + $0xf8] sm:$0xff]   ;;  %s1629_s19 = sshll.u32 %s2831_s16, 3 }
  0x10   : > { %v2087_v15 = vld [vmem:[%s2789_s1 + $0x8] sm:$0xff]   ;;  %v2089_v17 = vld [vmem:[%s2789_s1] sm:$0xff]   ;;  %v2099_v19 = vld [vmem:[%s2789_s1 + $0x118] sm:$0xff]   ;;  %s2629_s22 = scalar_lea.vmem %s2791_s3, %s1629_s19 }
  0x11   : > { %1768 = vmatpush3.bf16.msra.mxu0 %v2077_v3  ;;  %2058 = vmatpush3.bf16.msra.mxu1 %v2077_v3  ;;  %s2291_s9 = scalar_lea.vmem %s2788_s0, %s2065_s29  ;;  %v2097_v22 = vld [vmem:[%s2789_s1 + $0xb8] sm:$0xff]   ;;  %v2098_v23 = vld [vmem:[%s2789_s1 + $0xf0] sm:$0xff]   ;;  %v2107_v28 = vld [vmem:[%s2789_s1 + $0xe8] sm:$0xff]  }
  0x12   : > { %1769 = vmatprep.subr.bf16.mxu0 %v2078_v4  ;;  %2051 = vmatprep.subr.bf16.mxu1 %v2078_v4  ;;  %v2092_v11 = vld [vmem:[%s2291_s9 + $0x4] ss:$20 sps:$4 sm:$0xff]   ;;  %v2090_v20 = vld [vmem:[%s2291_s9] ss:$20 sps:$4 sm:$0xff]   ;;  %v2105_v27 = vld [vmem:[%s2291_s9 + $0x28] ss:$20 sps:$4 sm:$0xff]  }
  0x13   : > { %v2095_v12 = vld [vmem:[%s2291_s9 + $0x1e4] ss:$20 sps:$4 sm:$0xff]   ;;  %1050 = vmatprep.mubr.bf16.mxu0 %v2092_v11  ;;  %v2093_v21 = vld [vmem:[%s2291_s9 + $0x1e0] ss:$20 sps:$4 sm:$0xff]   ;;  %v2106_v29 = vld [vmem:[%s2291_s9 + $0x208] ss:$20 sps:$4 sm:$0xff]  }
  0x14   : > { %1146 = vmatprep.mubr.bf16.mxu1 %v2095_v12  ;;  %v2101_v24 = vld [vmem:[%s2291_s9 + $0x2c] ss:$20 sps:$4 sm:$0xff]   ;;  %v2100_v26 = vld [vmem:[%s2789_s1 + $0xb0] sm:$0xff]   ;;  %v2117_v37 = vld [vmem:[%s2789_s1 + $0xd8] sm:$0xff]  }
  0x15   : > { %1770 = vmatpush3.bf16.msra.mxu0 %v2079_v5  ;;  %2059 = vmatpush3.bf16.msra.mxu1 %v2079_v5  ;;  %v2103_v25 = vld [vmem:[%s2291_s9 + $0x20c] ss:$20 sps:$4 sm:$0xff]   ;;  %v2111_v32 = vld [vmem:[%s2291_s9 + $0x54] ss:$20 sps:$4 sm:$0xff]   ;;  %v2115_v36 = vld [vmem:[%s2291_s9 + $0x50] ss:$20 sps:$4 sm:$0xff]  }
  0x16   : > { %1771 = vmatprep.subr.bf16.mxu0 %v2080_v6  ;;  %2052 = vmatprep.subr.bf16.mxu1 %v2080_v6  ;;  %v2108_v30 = vld [vmem:[%s2789_s1 + $0xa8] sm:$0xff]   ;;  %v2109_v31 = vld [vmem:[%s2789_s1 + $0xe0] sm:$0xff]   ;;  %v2130_v35 = vld [vmem:[%s2789_s1 + $0x110] sm:$0xff]  }
  0x17   : > { %v2113_v33 = vld [vmem:[%s2291_s9 + $0x234] ss:$20 sps:$4 sm:$0xff]   ;;  %v2110_v34 = vld [vmem:[%s2789_s1 + $0xa0] sm:$0xff]   ;;  %v2118_v39 = vld [vmem:[%s2789_s1 + $0x98] sm:$0xff]  }
  0x18   : > { %v2116_v38 = vld [vmem:[%s2291_s9 + $0x230] ss:$20 sps:$4 sm:$0xff]   ;;  %v2125_v44 = vld [vmem:[%s2291_s9 + $0x78] ss:$20 sps:$4 sm:$0xff]   ;;  %v2134_v53 = vld [vmem:[%s2291_s9 + $0x8] ss:$20 sps:$4 sm:$0xff]  }
  0x19   : > { %1772 = vmatpush3.bf16.msra.mxu0 %v2081_v7  ;;  %2060 = vmatpush3.bf16.msra.mxu1 %v2081_v7  ;;  %v2119_v40 = vld [vmem:[%s2789_s1 + $0xd0] sm:$0xff]   ;;  %v2126_v45 = vld [vmem:[%s2291_s9 + $0x258] ss:$20 sps:$4 sm:$0xff]   ;;  %v2129_v49 = vld [vmem:[%s2789_s1 + $0xc0] sm:$0xff]  }
  0x1a   : > { %1773 = vmatprep.subr.bf16.mxu0 %v2082_v8  ;;  %2053 = vmatprep.subr.bf16.mxu1 %v2082_v8  ;;  %v2121_v41 = vld [vmem:[%s2291_s9 + $0x7c] ss:$20 sps:$4 sm:$0xff]   ;;  %v2127_v46 = vld [vmem:[%s2789_s1 + $0xc8] sm:$0xff]   ;;  %v2132_v50 = vld [vmem:[%s2291_s9 + $0xa4] ss:$20 sps:$4 sm:$0xff]  }
  0x1b   : > { %v2123_v42 = vld [vmem:[%s2291_s9 + $0x25c] ss:$20 sps:$4 sm:$0xff]   ;;  %v2150_v47 = vld [vmem:[%s2789_s1 + $0x108] sm:$0xff]   ;;  %v2131_v52 = vld [vmem:[%s2789_s1 + $0x80] sm:$0xff]  }
  0x1c   : > { %v2120_v43 = vld [vmem:[%s2789_s1 + $0x90] sm:$0xff]   ;;  %v2128_v48 = vld [vmem:[%s2789_s1 + $0x88] sm:$0xff]   ;;  %v2169_v56 = vld [vmem:[%s2789_s1 + $0x100] sm:$0xff]  }
  0x1d   : > { %1774 = vmatpush3.bf16.msra.mxu0 %v2083_v9  ;;  %2061 = vmatpush3.bf16.msra.mxu1 %v2083_v9  ;;  %v2136_v51 = vld [vmem:[%s2291_s9 + $0xc] ss:$20 sps:$4 sm:$0xff]   ;;  %v2140_v57 = vld [vmem:[%s2291_s9 + $0x34] ss:$20 sps:$4 sm:$0xff]   ;;  %v2143_v59 = vld [vmem:[%s2291_s9 + $0x30] ss:$20 sps:$4 sm:$0xff]  }
  0x1e   : > { %1775 = vmatprep.subr.bf16.mxu0 %v2084_v10  ;;  %2054 = vmatprep.subr.bf16.mxu1 %v2084_v10  ;;  %v2137_v54 = vld [vmem:[%s2291_s9 + $0xa0] ss:$20 sps:$4 sm:$0xff]   ;;  %v2142_v58 = vld [vmem:[%s2291_s9 + $0xc8] ss:$20 sps:$4 sm:$0xff]   ;;  %v2148_v62 = vld [vmem:[%s2291_s9 + $0xf0] ss:$20 sps:$4 sm:$0xff]  }
  0x1f   : > { %v2138_v55 = vld [vmem:[%s2291_s9 + $0xcc] ss:$20 sps:$4 sm:$0xff]   ;;  %v2144_v60 = vld [vmem:[%s2291_s9 + $0xf4] ss:$20 sps:$4 sm:$0xff]   ;;  %v2146_v61 = vld [vmem:[%s2291_s9 + $0x5c] ss:$20 sps:$4 sm:$0xff]  }
  0x20   : > { %v2149_v63 = vld [vmem:[%s2291_s9 + $0x58] ss:$20 sps:$4 sm:$0xff]   ;;  %v2151_v0 = vld [vmem:[%s2291_s9 + $0x11c] ss:$20 sps:$4 sm:$0xff]   ;;  %v2156_v3 = vld [vmem:[%s2291_s9 + $0x80] ss:$20 sps:$4 sm:$0xff]  }
  0x21   : > { %1776 = vmatpush3.bf16.msra.mxu0 %v2085_v13  ;;  %2062 = vmatpush3.bf16.msra.mxu1 %v2085_v13  ;;  %v2153_v1 = vld [vmem:[%s2291_s9 + $0x84] ss:$20 sps:$4 sm:$0xff]   ;;  %v2159_v5 = vld [vmem:[%s2291_s9 + $0xac] ss:$20 sps:$4 sm:$0xff]   ;;  %v2162_v7 = vld [vmem:[%s2291_s9 + $0xa8] ss:$20 sps:$4 sm:$0xff]  }
  0x22   : > { %1777 = vmatprep.subr.bf16.mxu0 %v2086_v14  ;;  %2055 = vmatprep.subr.bf16.mxu1 %v2086_v14  ;;  %v2155_v2 = vld [vmem:[%s2291_s9 + $0x118] ss:$20 sps:$4 sm:$0xff]   ;;  %v2161_v6 = vld [vmem:[%s2291_s9 + $0x140] ss:$20 sps:$4 sm:$0xff]   ;;  %v2167_v10 = vld [vmem:[%s2291_s9 + $0x168] ss:$20 sps:$4 sm:$0xff]  }
  0x23   : > { %v2157_v4 = vld [vmem:[%s2291_s9 + $0x144] ss:$20 sps:$4 sm:$0xff]   ;;  %v2163_v8 = vld [vmem:[%s2291_s9 + $0x16c] ss:$20 sps:$4 sm:$0xff]   ;;  %v2165_v9 = vld [vmem:[%s2291_s9 + $0xd4] ss:$20 sps:$4 sm:$0xff]  }
  0x24   : > { %v2168_v11 = vld [vmem:[%s2291_s9 + $0xd0] ss:$20 sps:$4 sm:$0xff]   ;;  %v2170_v12 = vld [vmem:[%s2291_s9 + $0x194] ss:$20 sps:$4 sm:$0xff]  }
  0x25   : > { %1778 = vmatpush3.bf16.msra.mxu0 %v2087_v15  ;;  %2063 = vmatpush3.bf16.msra.mxu1 %v2087_v15  ;;  %v2172_v13 = vld [vmem:[%s2291_s9 + $0xfc] ss:$20 sps:$4 sm:$0xff]   ;;  %v2175_v15 = vld [vmem:[%s2291_s9 + $0xf8] ss:$20 sps:$4 sm:$0xff]  }
  0x26   : > { %1779 = vmatprep.subr.bf16.mxu0 %v2088_v16  ;;  %2056 = vmatprep.subr.bf16.mxu1 %v2088_v16  ;;  %v2174_v14 = vld [vmem:[%s2291_s9 + $0x190] ss:$20 sps:$4 sm:$0xff]  }
  0x27   : > { %v2176_v16 = vld [vmem:[%s2291_s9 + $0x1bc] ss:$20 sps:$4 sm:$0xff]  }
  0x29   : > { %1780 = vmatpush3.bf16.msra.mxu0 %v2089_v17  ;;  %2064 = vmatpush3.bf16.msra.mxu1 %v2089_v17  ;;  %v2178_v17 = vld [vmem:[%s2291_s9 + $0x124] ss:$20 sps:$4 sm:$0xff]  }
  0x2a   : > { %1877 = vmatprep.subr.bf16.mxu1 %v2096_v18  ;;  %2009 = vmatprep.subr.bf16.mxu0 %v2099_v19  ;;  %v2180_v18 = vld [vmem:[%s2291_s9 + $0x1b8] ss:$20 sps:$4 sm:$0xff]  }
  0x2c   : > { %1051 = vmatmul.mubr.bf16.vlgmr.msra.gmra.mxu0 %v2090_v20  ;;  %1147 = vmatmul.mubr.bf16.vlgmr.msra.gmra.mxu1 %v2093_v21  ;;  %v2182_v20 = vld [vmem:[%s2291_s9 + $0x14c] ss:$20 sps:$4 sm:$0xff]   ;;  %v2184_v21 = vld [vmem:[%s2291_s9 + $0x10] ss:$20 sps:$4 sm:$0xff]  }
  0x2d   : > { %1878 = vmatpush3.bf16.msra.mxu1 %v2097_v22  ;;  %2010 = vmatpush3.bf16.msra.mxu0 %v2099_v19  ;;  %v2181_v19 = vld [vmem:[%s2291_s9 + $0x120] ss:$20 sps:$4 sm:$0xff]   ;;  %v2185_v22 = vld [vmem:[%s2291_s9 + $0x148] ss:$20 sps:$4 sm:$0xff]  }
  0x2e   : > { %1879 = vmatprep.subr.bf16.mxu1 %v2098_v23  ;;  %1058 = vmatprep.mubr.bf16.mxu0 %v2101_v24  ;;  %v2186_v23 = vld [vmem:[%s2291_s9 + $0x38] ss:$20 sps:$4 sm:$0xff]   ;;  %v2187_v24 = vld [vmem:[%s2291_s9 + $0x174] ss:$20 sps:$4 sm:$0xff]  }
  0x2f   : > { %1154 = vmatprep.mubr.bf16.mxu1 %v2103_v25  ;;  %2011 = vmatprep.subr.bf16.mxu0 %v2130_v35  ;;  %v2189_v25 = vld [vmem:[%s2291_s9 + $0x60] ss:$20 sps:$4 sm:$0xff]  }
  0x31   : > { %1880 = vmatpush3.bf16.msra.mxu1 %v2100_v26  ;;  %2012 = vmatpush3.bf16.msra.mxu0 %v2130_v35  ;;  %v2190_v26 = vld [vmem:[%s2291_s9 + $0x170] ss:$20 sps:$4 sm:$0xff]   ;;  %v2201_v35 = vld [vmem:[%s2291_s9 + $0x128] ss:$20 sps:$4 sm:$0xff]  }
  0x32   : > { %1881 = vmatprep.subr.bf16.mxu1 %v2107_v28  ;;  %2013 = vmatprep.subr.bf16.mxu0 %v2150_v47  ;;  %v2192_v28 = vld [vmem:[%s2291_s9 + $0x19c] ss:$20 sps:$4 sm:$0xff]  }
  0x34   : > { %1059 = vmatmul.mubr.bf16.gmra.mxu0 %v2105_v27  ;;  %1155 = vmatmul.mubr.bf16.gmra.mxu1 %v2106_v29  ;;  %v2191_v27 = vld [vmem:[%s2291_s9 + $0x88] ss:$20 sps:$4 sm:$0xff]   ;;  %v2194_v29 = vld [vmem:[%s2291_s9 + $0xb0] ss:$20 sps:$4 sm:$0xff]  }
  0x35   : > { %1882 = vmatpush3.bf16.msra.mxu1 %v2108_v30  ;;  %1066 = vmatprep.mubr.bf16.mxu0 %v2111_v32  ;;  %v2195_v30 = vld [vmem:[%s2291_s9 + $0x198] ss:$20 sps:$4 sm:$0xff]  }
  0x36   : > { %1883 = vmatprep.subr.bf16.mxu1 %v2109_v31  ;;  %1162 = vmatprep.mubr.bf16.mxu1 %v2113_v33  ;;  %v2196_v31 = vld [vmem:[%s2291_s9 + $0xd8] ss:$20 sps:$4 sm:$0xff]   ;;  %v2199_v33 = vld [vmem:[%s2291_s9 + $0x100] ss:$20 sps:$4 sm:$0xff]  }
  0x37   : > { %2014 = vmatpush3.bf16.msra.mxu0 %v2150_v47  ;;  %v2197_v32 = vld [vmem:[%s2291_s9 + $0x1c4] ss:$20 sps:$4 sm:$0xff]  }
  0x38   : > { %2015 = vmatprep.subr.bf16.mxu0 %v2169_v56  ;;  %v2216_v47 = vld [vmem:[%s2291_s9 + $0x218] ss:$20 sps:$4 sm:$0xff]  }
  0x39   : > { %1884 = vmatpush3.bf16.msra.mxu1 %v2110_v34  ;;  %v2200_v34 = vld [vmem:[%s2291_s9 + $0x1c0] ss:$20 sps:$4 sm:$0xff]  }
  0x3a   : > { %1885 = vmatprep.subr.bf16.mxu1 %v2117_v37  ;;  %v2204_v37 = vld [vmem:[%s2291_s9 + $0x150] ss:$20 sps:$4 sm:$0xff]  }
  0x3b   : > { %2016 = vmatpush3.bf16.msra.mxu0 %v2169_v56 }
  0x3c   : > { %1067 = vmatmul.mubr.bf16.gmra.mxu0 %v2115_v36  ;;  %1163 = vmatmul.mubr.bf16.gmra.mxu1 %v2116_v38  ;;  %v2202_v36 = vld [vmem:[%s2291_s9 + $0x1ec] ss:$20 sps:$4 sm:$0xff]   ;;  %v2205_v38 = vld [vmem:[%s2291_s9 + $0x1e8] ss:$20 sps:$4 sm:$0xff]  }
  0x3d   : > { %1886 = vmatpush3.bf16.msra.mxu1 %v2118_v39  ;;  %1074 = vmatprep.mubr.bf16.mxu0 %v2121_v41  ;;  %v2206_v39 = vld [vmem:[%s2291_s9 + $0x178] ss:$20 sps:$4 sm:$0xff]   ;;  %v2209_v41 = vld [vmem:[%s2291_s9 + $0x1a0] ss:$20 sps:$4 sm:$0xff]  }
  0x3e   : > { %1887 = vmatprep.subr.bf16.mxu1 %v2119_v40  ;;  %1170 = vmatprep.mubr.bf16.mxu1 %v2123_v42  ;;  %v2207_v40 = vld [vmem:[%s2291_s9 + $0x214] ss:$20 sps:$4 sm:$0xff]   ;;  %v2210_v42 = vld [vmem:[%s2291_s9 + $0x210] ss:$20 sps:$4 sm:$0xff]  }
  0x41   : > { %1888 = vmatpush3.bf16.msra.mxu1 %v2120_v43  ;;  %v2211_v43 = vld [vmem:[%s2291_s9 + $0x1c8] ss:$20 sps:$4 sm:$0xff]  }
  0x42   : > { %1889 = vmatprep.subr.bf16.mxu1 %v2127_v46  ;;  %v2215_v46 = vld [vmem:[%s2291_s9 + $0x238] ss:$20 sps:$4 sm:$0xff]  }
  0x44   : > { %1075 = vmatmul.mubr.bf16.gmra.mxu0 %v2125_v44  ;;  %1171 = vmatmul.mubr.bf16.gmra.mxu1 %v2126_v45  ;;  %v2212_v44 = vld [vmem:[%s2291_s9 + $0x23c] ss:$20 sps:$4 sm:$0xff]  }
  0x45   : > { %1890 = vmatpush3.bf16.msra.mxu1 %v2128_v48  ;;  %1082 = vmatprep.mubr.bf16.mxu0 %v2132_v50  ;;  %v2214_v45 = vld [vmem:[%s2291_s9 + $0x1f0] ss:$20 sps:$4 sm:$0xff]   ;;  %v2220_v50 = vld [vmem:[%s2291_s9 + $0x260] ss:$20 sps:$4 sm:$0xff]  }
  0x46   : > { %1891 = vmatprep.subr.bf16.mxu1 %v2129_v49  ;;  %1211 = vmatprep.mubr.bf16.mxu1 %v2136_v51  ;;  %v2217_v48 = vld [vmem:[%s2291_s9 + $0x264] ss:$20 sps:$4 sm:$0xff]   ;;  %v2219_v49 = vld [vmem:[%s2291_s9 + $0x240] ss:$20 sps:$4 sm:$0xff]   ;;  %v2221_v51 = vld [vmem:[%s2291_s9 + $0x268] ss:$20 sps:$4 sm:$0xff]  }
  0x49   : > { %1892 = vmatpush3.bf16.msra.mxu1 %v2131_v52 }
  0x4c   : > { %1083 = vmatmul.mubr.bf16.gmra.mxu0 %v2137_v54  ;;  %1212 = vmatmul.mubr.bf16.vlgmr.msra.gmra.mxu1 %v2134_v53 }
  0x4d   : > { %1090 = vmatprep.mubr.bf16.mxu0 %v2138_v55  ;;  %1219 = vmatprep.mubr.bf16.mxu1 %v2140_v57 }
  0x54   : > { %1091 = vmatmul.mubr.bf16.gmra.mxu0 %v2142_v58  ;;  %1220 = vmatmul.mubr.bf16.gmra.mxu1 %v2143_v59 }
  0x55   : > { %1098 = vmatprep.mubr.bf16.mxu0 %v2144_v60  ;;  %1227 = vmatprep.mubr.bf16.mxu1 %v2146_v61 }
  0x5c   : > { %1099 = vmatmul.mubr.bf16.gmra.mxu0 %v2148_v62  ;;  %1228 = vmatmul.mubr.bf16.gmra.mxu1 %v2149_v63 }
  0x5d   : > { %1106 = vmatprep.mubr.bf16.mxu0 %v2151_v0  ;;  %1235 = vmatprep.mubr.bf16.mxu1 %v2153_v1 }
  0x64   : > { %1107 = vmatmul.mubr.bf16.gmra.mxu0 %v2155_v2  ;;  %1236 = vmatmul.mubr.bf16.gmra.mxu1 %v2156_v3 }
  0x65   : > { %1114 = vmatprep.mubr.bf16.mxu0 %v2157_v4  ;;  %1243 = vmatprep.mubr.bf16.mxu1 %v2159_v5 }
  0x6c   : > { %1115 = vmatmul.mubr.bf16.gmra.mxu0 %v2161_v6  ;;  %1244 = vmatmul.mubr.bf16.gmra.mxu1 %v2162_v7 }
  0x6d   : > { %1122 = vmatprep.mubr.bf16.mxu0 %v2163_v8  ;;  %1251 = vmatprep.mubr.bf16.mxu1 %v2165_v9 }
  0x74   : > { %1123 = vmatmul.mubr.bf16.gmra.mxu0 %v2167_v10  ;;  %1252 = vmatmul.mubr.bf16.gmra.mxu1 %v2168_v11 }
  0x75   : > { %1130 = vmatprep.mubr.bf16.mxu0 %v2170_v12  ;;  %1259 = vmatprep.mubr.bf16.mxu1 %v2172_v13 }
  0x7c   : > { %1131 = vmatmul.mubr.bf16.gmra.mxu0 %v2174_v14  ;;  %1260 = vmatmul.mubr.bf16.gmra.mxu1 %v2175_v15 }
  0x7d   : > { %1138 = vmatprep.mubr.bf16.mxu0 %v2176_v16  ;;  %1267 = vmatprep.mubr.bf16.mxu1 %v2178_v17 }
  0x84   : > { %1139 = vmatmul.mubr.bf16.gmra.mxu0 %v2180_v18  ;;  %1268 = vmatmul.mubr.bf16.gmra.mxu1 %v2181_v19 }
  0x85   : > { %1275 = vmatprep.mubr.bf16.mxu1 %v2182_v20  ;;  %2017 = vmatprep.mubr.msk.bf16.mxu0 %vm969_vm0, %v2184_v21 }
  0x8c   : > { %1276 = vmatmul.mubr.bf16.gmra.mxu1 %v2185_v22  ;;  %2018 = vmatmul.mubr.msk.bf16.vlgmr.msra.gmra.mxu0 %vm969_vm0, %v2186_v23 }
  0x8d   : > { %1283 = vmatprep.mubr.bf16.mxu1 %v2187_v24  ;;  %2021 = vmatprep.mubr.msk.bf16.mxu0 %vm969_vm0, %v2189_v25 }
  0x94   : > { %1284 = vmatmul.mubr.bf16.gmra.mxu1 %v2190_v26  ;;  %2022 = vmatmul.mubr.msk.bf16.gmra.mxu0 %vm969_vm0, %v2191_v27 }
  0x95   : > { %1291 = vmatprep.mubr.bf16.mxu1 %v2192_v28  ;;  %2025 = vmatprep.mubr.msk.bf16.mxu0 %vm969_vm0, %v2194_v29 }
  0x9c   : > { %1292 = vmatmul.mubr.bf16.gmra.mxu1 %v2195_v30  ;;  %2026 = vmatmul.mubr.msk.bf16.gmra.mxu0 %vm969_vm0, %v2196_v31 }
  0x9d   : > { %1299 = vmatprep.mubr.bf16.mxu1 %v2197_v32  ;;  %2029 = vmatprep.mubr.msk.bf16.mxu0 %vm969_vm0, %v2199_v33 }
  0xa4   : > { %1300 = vmatmul.mubr.bf16.gmra.mxu1 %v2200_v34  ;;  %2030 = vmatmul.mubr.msk.bf16.gmra.mxu0 %vm969_vm0, %v2201_v35 }
  0xa5   : > { %1307 = vmatprep.mubr.bf16.mxu1 %v2202_v36  ;;  %2033 = vmatprep.mubr.msk.bf16.mxu0 %vm969_vm0, %v2204_v37 }
  0xac   : > { %1308 = vmatmul.mubr.bf16.gmra.mxu1 %v2205_v38  ;;  %2034 = vmatmul.mubr.msk.bf16.gmra.mxu0 %vm969_vm0, %v2206_v39 }
  0xad   : > { %1315 = vmatprep.mubr.bf16.mxu1 %v2207_v40  ;;  %2037 = vmatprep.mubr.msk.bf16.mxu0 %vm969_vm0, %v2209_v41 }
  0xb4   : > { %1316 = vmatmul.mubr.bf16.gmra.mxu1 %v2210_v42  ;;  %2038 = vmatmul.mubr.msk.bf16.gmra.mxu0 %vm969_vm0, %v2211_v43 }
  0xb5   : > { %1323 = vmatprep.mubr.bf16.mxu1 %v2212_v44  ;;  %2041 = vmatprep.mubr.msk.bf16.mxu0 %vm969_vm0, %v2214_v45 }
  0xbc   : > { %1324 = vmatmul.mubr.bf16.gmra.mxu1 %v2215_v46  ;;  %2042 = vmatmul.mubr.msk.bf16.gmra.mxu0 %vm969_vm0, %v2216_v47 }
  0xbd   : > { %1331 = vmatprep.mubr.bf16.mxu1 %v2217_v48  ;;  %2045 = vmatprep.mubr.msk.bf16.mxu0 %vm969_vm0, %v2219_v49 }
  0xc4   : > { %1332 = vmatmul.mubr.bf16.gmra.mxu1 %v2220_v50  ;;  %2046 = vmatmul.mubr.msk.bf16.gmra.mxu0 %vm969_vm0, %v2221_v51 }
  0xec   : > { %v1781_v52 = vpop.f32.mrf.mxu0  ;;  %v1853_v53 = vpop.f32.mrf.mxu1 }
  0xee   : > { %v1782_v54 = vpop.f32.mrf.mxu0  ;;  %v1854_v55 = vpop.f32.mrf.mxu1 }
  0xef   : > { %v2470_v56 = vadd.f32 %v1782_v54, %v1781_v52  ;;  %v2472_v57 = vadd.f32 %v1854_v55, %v1853_v53 }
  0xf0   : > { %v1784_v58 = vpop.f32.mrf.mxu0  ;;  %v1856_v59 = vpop.f32.mrf.mxu1 }
  0xf1   : > { %2792 = vst [vmem:[#allocation2_spill] sm:$0xff] %v2472_v57 }
  0xf2   : > { %v1785_v60 = vpop.f32.mrf.mxu0  ;;  %v1857_v61 = vpop.f32.mrf.mxu1 }
  0xf3   : > { %v2474_v62 = vadd.f32 %v1785_v60, %v1784_v58  ;;  %v2476_v63 = vadd.f32 %v1857_v61, %v1856_v59 }
  0xf4   : > { %v1787_v0 = vpop.f32.mrf.mxu0  ;;  %v1859_v1 = vpop.f32.mrf.mxu1 }
  0xf5   : > { %2793 = vst [vmem:[#allocation3_spill] sm:$0xff] %v2476_v63 }
  0xf6   : > { %v1788_v2 = vpop.f32.mrf.mxu0  ;;  %v1860_v3 = vpop.f32.mrf.mxu1 }
  0xf7   : > { %v2478_v4 = vadd.f32 %v1788_v2, %v1787_v0  ;;  %v2480_v5 = vadd.f32 %v1860_v3, %v1859_v1 }
  0xf8   : > { %v1790_v6 = vpop.f32.mrf.mxu0  ;;  %v1862_v7 = vpop.f32.mrf.mxu1 }
  0xf9   : > { %2794 = vst [vmem:[#allocation4_spill] sm:$0xff] %v2480_v5  ;;  %v2601_v5 = vld [vmem:[%s2790_s2] ss:$0 sm:$0xff] }
  0xfa   : > { %v1791_v8 = vpop.f32.mrf.mxu0  ;;  %v1863_v9 = vpop.f32.mrf.mxu1 }
  0xfb   : > { %v2482_v10 = vadd.f32 %v1791_v8, %v1790_v6  ;;  %v2484_v11 = vadd.f32 %v1863_v9, %v1862_v7 }
  0xfc   : > { %v1793_v12 = vpop.f32.mrf.mxu0  ;;  %v1865_v13 = vpop.f32.mrf.mxu1 }
  0xfd   : > { %2795 = vst [vmem:[#allocation5_spill] sm:$0xff] %v2484_v11 }
  0xfe   : > { %v1794_v14 = vpop.f32.mrf.mxu0  ;;  %v1866_v15 = vpop.f32.mrf.mxu1 }
  0xff   : > { %v2486_v16 = vadd.f32 %v1794_v14, %v1793_v12  ;;  %v2488_v17 = vadd.f32 %v1866_v15, %v1865_v13 }
 0x100   : > { %v1796_v18 = vpop.f32.mrf.mxu0  ;;  %v1868_v19 = vpop.f32.mrf.mxu1 }
 0x101   : > { %2796 = vst [vmem:[#allocation6_spill] sm:$0xff] %v2488_v17 }
 0x102   : > { %v1797_v20 = vpop.f32.mrf.mxu0  ;;  %v1869_v21 = vpop.f32.mrf.mxu1 }
 0x103   : > { %v2490_v22 = vadd.f32 %v1797_v20, %v1796_v18  ;;  %v2492_v23 = vadd.f32 %v1869_v21, %v1868_v19 }
 0x104   : > { %v1799_v24 = vpop.f32.mrf.mxu0  ;;  %v1871_v25 = vpop.f32.mrf.mxu1 }
 0x105   : > { %2797 = vst [vmem:[#allocation7_spill] sm:$0xff] %v2492_v23 }
 0x106   : > { %v1800_v26 = vpop.f32.mrf.mxu0  ;;  %v1872_v27 = vpop.f32.mrf.mxu1 }
 0x107   : > { %v2494_v28 = vadd.f32 %v1800_v26, %v1799_v24  ;;  %v2496_v29 = vadd.f32 %v1872_v27, %v1871_v25 }
 0x108   : > { %v1802_v30 = vpop.f32.mrf.mxu0  ;;  %v1874_v31 = vpop.f32.mrf.mxu1 }
 0x109   : > { %2798 = vst [vmem:[#allocation8_spill] sm:$0xff] %v2496_v29 }
 0x10a   : > { %v1803_v32 = vpop.f32.mrf.mxu0  ;;  %v1875_v33 = vpop.f32.mrf.mxu1 }
 0x10b   : > { %v2498_v34 = vadd.f32 %v1803_v32, %v1802_v30  ;;  %v2500_v35 = vadd.f32 %v1875_v33, %v1874_v31 }
 0x10c   : > { %v1805_v36 = vpop.f32.mrf.mxu0  ;;  %v2502_v37 = vpop.f32.mrf.mxu1 }
 0x10d   : > { %2799 = vst [vmem:[#allocation9_spill] sm:$0xff] %v2500_v35 }
 0x10e   : > { %v1806_v38 = vpop.f32.mrf.mxu0  ;;  %v2504_v39 = vpop.f32.mrf.mxu1 }
 0x10f   : > { %v2506_v40 = vadd.f32 %v1806_v38, %v1805_v36 }
 0x110   : > { %v1808_v41 = vpop.f32.mrf.mxu0  ;;  %v2508_v42 = vpop.f32.mrf.mxu1 }
 0x112   : > { %v1809_v43 = vpop.f32.mrf.mxu0  ;;  %v2510_v44 = vpop.f32.mrf.mxu1 }
 0x113   : > { %v2512_v45 = vadd.f32 %v1809_v43, %v1808_v41 }
 0x114   : > { %v1811_v46 = vpop.f32.mrf.mxu0  ;;  %v1899_v47 = vpop.f32.mrf.mxu1 }
 0x116   : > { %v1812_v48 = vpop.f32.mrf.mxu0  ;;  %v1900_v49 = vpop.f32.mrf.mxu1 }
 0x117   : > { %v2514_v50 = vadd.f32 %v1812_v48, %v1811_v46  ;;  %v1901_v57 = vadd.f32 %v1900_v49, %v1899_v47  ;;  %v1053_v47 = vadd.f32 %v2470_v56, %v2601_v5 }
 0x118   : > { %v1814_v51 = vpop.f32.mrf.mxu0  ;;  %v1902_v52 = vpop.f32.mrf.mxu1 }
 0x11a   : > { %v1815_v53 = vpop.f32.mrf.mxu0  ;;  %v1903_v54 = vpop.f32.mrf.mxu1 }
 0x11b   : > { %v2516_v55 = vadd.f32 %v1815_v53, %v1814_v51  ;;  %v1904_v49 = vadd.f32 %v1903_v54, %v1902_v52 }
 0x11c   : > { %v1817_v58 = vpop.f32.mrf.mxu0  ;;  %v2518_v59 = vpop.f32.mrf.mxu1 }
 0x11e   : > { %v1818_v60 = vpop.f32.mrf.mxu0  ;;  %v2520_v61 = vpop.f32.mrf.mxu1 }
 0x11f   : > { %v2522_v0 = vadd.f32 %v1818_v60, %v1817_v58 }
 0x120   : > { %v1820_v1 = vpop.f32.mrf.mxu0  ;;  %v2524_v2 = vpop.f32.mrf.mxu1 }
 0x122   : > { %v1821_v3 = vpop.f32.mrf.mxu0  ;;  %v2526_v6 = vpop.f32.mrf.mxu1 }
 0x123   : > { %v2528_v7 = vadd.f32 %v1821_v3, %v1820_v1 }
 0x124   : > { %v2530_v8 = vpop.f32.mrf.mxu0  ;;  %v1911_v9 = vpop.f32.mrf.mxu1 }
 0x126   : > { %v2532_v12 = vpop.f32.mrf.mxu0  ;;  %v1912_v13 = vpop.f32.mrf.mxu1 }
 0x127   : > { %v1913_v52 = vadd.f32 %v1912_v13, %v1911_v9  ;;  %v1069_v9 = vadd.f32 %v2486_v16, %v2601_v5  ;;  %v1910_v16 = vadd.f32 %v2526_v6, %v2524_v2  ;;  %v1093_v2 = vadd.f32 %v2514_v50, %v2601_v5 }
 0x128   : > { %v2534_v14 = vpop.f32.mrf.mxu0  ;;  %v2536_v15 = vpop.f32.mrf.mxu1 }
 0x12a   : > { %v2538_v18 = vpop.f32.mrf.mxu0  ;;  %v2540_v19 = vpop.f32.mrf.mxu1 }
 0x12c   : > { %v2542_v20 = vpop.f32.mrf.mxu0  ;;  %v2544_v21 = vpop.f32.mrf.mxu1 }
 0x12e   : > { %v2546_v24 = vpop.f32.mrf.mxu0  ;;  %v2548_v25 = vpop.f32.mrf.mxu1 }
 0x130   : > { %v2550_v26 = vpop.f32.mrf.mxu0  ;;  %v2552_v27 = vpop.f32.mrf.mxu1 }
 0x131   : > { %2800 = vst [vmem:[#allocation10_spill] sm:$0xff] %v2550_v26 }
 0x132   : > { %v2554_v30 = vpop.f32.mrf.mxu0  ;;  %v2556_v31 = vpop.f32.mrf.mxu1 }
 0x133   : > { %2801 = vst [vmem:[#allocation11_spill] sm:$0xff] %v2554_v30 }
 0x134   : > { %v2558_v32 = vpop.f32.mrf.mxu0  ;;  %v2560_v33 = vpop.f32.mrf.mxu1 }
 0x136   : > { %v2562_v36 = vpop.f32.mrf.mxu0  ;;  %v2564_v38 = vpop.f32.mrf.mxu1 }
 0x138   : > { %v2566_v41 = vpop.f32.mrf.mxu0  ;;  %v2568_v43 = vpop.f32.mrf.mxu1 }
 0x13a   : > { %v2570_v46 = vpop.f32.mrf.mxu0  ;;  %v2572_v48 = vpop.f32.mrf.mxu1 }
 0x13b   : > { %2802 = vst [vmem:[#allocation12_spill] sm:$0xff] %v2570_v46  ;;  %v1064_v46 = vadd.f32 %v2482_v10, %v2601_v5  ;;  %v1928_v50 = vadd.f32 %v2572_v48, %v2568_v43 }
 0x13c   : > { %v2574_v51 = vpop.f32.mrf.mxu0  ;;  %v2576_v53 = vpop.f32.mrf.mxu1 }
 0x13d   : > { %2803 = vst [vmem:[#allocation13_spill] sm:$0xff] %v2574_v51  ;;  %v1895_v51 = vadd.f32 %v2504_v39, %v2502_v37 }
 0x13e   : > { %v2578_v58 = vpop.f32.mrf.mxu0  ;;  %v2580_v60 = vpop.f32.mrf.mxu1 }
 0x13f   : > { %2804 = vst [vmem:[#allocation14_spill] sm:$0xff] %v2578_v58  ;;  %v1061_v58 = vadd.f32 %v2478_v4, %v2601_v5  ;;  %v1898_v4 = vadd.f32 %v2510_v44, %v2508_v42  ;;  %v1214_v39 = vadd.f32 %v1895_v51, %v1053_v47  ;;  %v1077_v42 = vadd.f32 %v2494_v28, %v2601_v5 }
 0x140   : > { %v2582_v1 = vpop.f32.mrf.mxu0  ;;  %v2584_v3 = vpop.f32.mrf.mxu1  ;;  %v1916_v28 = vadd.f32 %v2540_v19, %v2536_v15  ;;  %v1072_v15 = vadd.f32 %v2490_v22, %v2601_v5  ;;  %v1919_v22 = vadd.f32 %v2548_v25, %v2544_v21  ;;  %v1096_v21 = vadd.f32 %v2516_v55, %v2601_v5 }
 0x141   : > { %2805 = vst [vmem:[#allocation15_spill] sm:$0xff] %v2582_v1  ;;  %v1222_v30 = vadd.f32 %v1901_v57, %v1061_v58  ;;  %v1225_v58 = vadd.f32 %v1904_v49, %v1064_v46  ;;  %v1825_v25 = vadd.f32 %v2532_v12, %v2530_v8 }
 0x142   : > { %v2586_v35 = vpop.f32.mrf.mxu0  ;;  %v2588_v29 = vpop.f32.mrf.mxu1 }
 0x143   : > { %2806 = vst [vmem:[#allocation16_spill] sm:$0xff] %v2586_v35 }
 0x144   : > { %v2590_v23 = vpop.f32.mrf.mxu0  ;;  %v2592_v17 = vpop.f32.mrf.mxu1 }
 0x145   : > { %2807 = vst [vmem:[#allocation17_spill] sm:$0xff] %v2590_v23 }
 0x146   : > { %v2594_v63 = vpop.f32.mrf.mxu0  ;;  %v2596_v11 = vpop.f32.mrf.mxu1 }
 0x147   : > { %2808 = vst [vmem:[#allocation18_spill] sm:$0xff] %v2594_v63  ;;  %v1937_v8 = vadd.f32 %v2596_v11, %v2592_v17 }
 0x148   : > { %v2603_v1 = vpop.f32.mrf.mxu0  ;;  %v2605_v35 = vpop.f32.mrf.mxu1 }
 0x149   : > { %2809 = vst [vmem:[#allocation19_spill] sm:$0xff] %v2603_v1 }
 0x14a   : > { %v2611_v23 = vpop.f32.mrf.mxu0  ;;  %v2613_v63 = vpop.f32.mrf.mxu1 }
 0x14b   : > { %2810 = vst [vmem:[#allocation20_spill] sm:$0xff] %v2611_v23  ;;  %v1056_v23 = vadd.f32 %v2474_v62, %v2601_v5 }
 0x14c   : > { %v2618_v26 = vpop.f32.mrf.mxu1  ;;  %v2019_v1 = vpop.f32.mrf.mxu0 }
 0x14d   : > { %v1383_v37 = vadd.f32 %v2019_v1, %v1222_v30  ;;  %v1907_v30 = vadd.f32 %v2520_v61, %v2518_v59  ;;  %v1217_v47 = vadd.f32 %v1898_v4, %v1056_v23  ;;  %v1080_v59 = vadd.f32 %v2498_v34, %v2601_v5 }
 0x14e   : > { %v2631_v56 = vpop.f32.mrf.mxu1  ;;  %v1374_v57 = vpop.f32.mrf.mxu0  ;;  %v1925_v34 = vadd.f32 %v2564_v38, %v2560_v33  ;;  %v1085_v33 = vadd.f32 %v2506_v40, %v2601_v5 }
 0x14f   : > { %v1503_v10 = vmax.f32 %v1383_v37, 0.0  ;;  %v1375_v54 = vadd.f32 %v1374_v57, %v1214_v39  ;;  %v1238_v39 = vadd.f32 %v1913_v52, %v1077_v42  ;;  %v1241_v42 = vadd.f32 %v1916_v28, %v1080_v59 }
 0x150   : > { %v2635_v44 = vpop.f32.mrf.mxu1  ;;  %v2020_v62 = vpop.f32.mrf.mxu0  ;;  %v1254_v28 = vadd.f32 %v1925_v34, %v1093_v2  ;;  %v1246_v48 = vadd.f32 %v1919_v22, %v1085_v33  ;;  %v1088_v59 = vadd.f32 %v2512_v45, %v2601_v5  ;;  %v1931_v45 = vadd.f32 %v2580_v60, %v2576_v53 }
 0x151   : > { %1535 = vst [vmem:[%s2629_s22 + $0x10] sm:$0xff] %v1503_v10  ;;  %v1501_v51 = vmax.f32 %v1375_v54, 0.0  ;;  %v1386_v1 = vadd.f32 %v2020_v62, %v1225_v58  ;;  %v1230_v10 = vadd.f32 %v1907_v30, %v1069_v9  ;;  %v1837_v60 = vadd.f32 %v2562_v36, %v2558_v32 }
 0x152   : > { %v2642_v13 = vpop.f32.mrf.mxu1  ;;  %v1377_v46 = vpop.f32.mrf.mxu0 }
 0x153   : > { %1533 = vst [vmem:[%s2629_s22] sm:$0xff] %v1501_v51  ;;  %v1504_v49 = vmax.f32 %v1386_v1, 0.0  ;;  %v1378_v37 = vadd.f32 %v1377_v46, %v1217_v47  ;;  %v1233_v1 = vadd.f32 %v1910_v16, %v1072_v15 }
 0x154   : > { %v2649_v61 = vpop.f32.mrf.mxu1  ;;  %v2023_v23 = vpop.f32.mrf.mxu0 }
 0x155   : > { %1536 = vst [vmem:[%s2629_s22 + $0x18] sm:$0xff] %v1504_v49  ;;  %v1502_v4 = vmax.f32 %v1378_v37, 0.0  ;;  %v1399_v57 = vadd.f32 %v2023_v23, %v1238_v39  ;;  %v1922_v37 = vadd.f32 %v2556_v31, %v2552_v27  ;;  %v1109_v27 = vadd.f32 %v1825_v25, %v2601_v5  ;;  %v2813_v25 = vld [vmem:[#allocation11_spill] sm:$0xff] }
 0x156   : > { %v2656_v19 = vpop.f32.mrf.mxu1  ;;  %v1390_v52 = vpop.f32.mrf.mxu0  ;;  %v1828_v31 = vadd.f32 %v2538_v18, %v2534_v14  ;;  %v1940_v14 = vadd.f32 %v2613_v63, %v2605_v35  ;;  %v1104_v35 = vadd.f32 %v2528_v7, %v2601_v5 }
 0x157   : > { %1534 = vst [vmem:[%s2629_s22 + $0x8] sm:$0xff] %v1502_v4  ;;  %v1507_v54 = vmax.f32 %v1399_v57, 0.0  ;;  %v1391_v58 = vadd.f32 %v1390_v52, %v1230_v10  ;;  %v1257_v4 = vadd.f32 %v1928_v50, %v1096_v21  ;;  %v1249_v17 = vadd.f32 %v1922_v37, %v1088_v59  ;;  %v2811_v50 = vld [vmem:[#allocation12_spill] sm:$0xff]  ;;  %v2812_v21 = vld [vmem:[#allocation10_spill] sm:$0xff]  ;;  %v2814_v59 = vld [vmem:[#allocation17_spill] sm:$0xff] }
 0x158   : > { %v2663_v6 = vpop.f32.mrf.mxu1  ;;  %v2024_v62 = vpop.f32.mrf.mxu0  ;;  %v1101_v52 = vadd.f32 %v2522_v0, %v2601_v5  ;;  %v1112_v53 = vadd.f32 %v1828_v31, %v2601_v5  ;;  %v1934_v0 = vadd.f32 %v2588_v29, %v2584_v3  ;;  %v1949_v32 = vadd.f32 %v2656_v19, %v2649_v61 }
 0x159   : > { %1539 = vst [vmem:[%s2629_s22 + $0x30] sm:$0xff] %v1507_v54  ;;  %v1505_v30 = vmax.f32 %v1391_v58, 0.0  ;;  %v1402_v51 = vadd.f32 %v2024_v62, %v1241_v42  ;;  %v1270_v42 = vadd.f32 %v1937_v8, %v1109_v27  ;;  %v1125_v3 = vadd.f32 %v1837_v60, %v2601_v5 }
 0x15a   : > { %v2670_v38 = vpop.f32.mrf.mxu1  ;;  %v1393_v47 = vpop.f32.mrf.mxu0  ;;  %v1262_v63 = vadd.f32 %v1931_v45, %v1101_v52  ;;  %v1273_v29 = vadd.f32 %v1940_v14, %v1112_v53  ;;  %v1265_v61 = vadd.f32 %v1934_v0, %v1104_v35  ;;  %v2817_v45 = vld [vmem:[#allocation14_spill] sm:$0xff]  ;;  %v2821_v35 = vld [vmem:[#allocation16_spill] sm:$0xff] }
 0x15b   : > { %1537 = vst [vmem:[%s2629_s22 + $0x20] sm:$0xff] %v1505_v30  ;;  %v1508_v9 = vmax.f32 %v1402_v51, 0.0  ;;  %v1394_v46 = vadd.f32 %v1393_v47, %v1233_v1  ;;  %v1831_v51 = vadd.f32 %v2546_v24, %v2542_v20  ;;  %v1943_v20 = vadd.f32 %v2631_v56, %v2618_v26 }
 0x15c   : > { %v2679_v49 = vpop.f32.mrf.mxu1  ;;  %v2027_v40 = vpop.f32.mrf.mxu0  ;;  %v1286_v26 = vadd.f32 %v1949_v32, %v1125_v3 }
 0x15d   : > { %1540 = vst [vmem:[%s2629_s22 + $0x38] sm:$0xff] %v1508_v9  ;;  %v1506_v39 = vmax.f32 %v1394_v46, 0.0  ;;  %v1415_v43 = vadd.f32 %v2027_v40, %v1254_v28  ;;  %v1840_v9 = vadd.f32 %v2811_v50, %v2566_v41  ;;  %v1117_v19 = vadd.f32 %v1831_v51, %v2601_v5 }
 0x15e   : > { %v2686_v23 = vpop.f32.mrf.mxu1  ;;  %v1406_v55 = vpop.f32.mrf.mxu0  ;;  %v1834_v40 = vadd.f32 %v2813_v25, %v2812_v21  ;;  %v1952_v41 = vadd.f32 %v2670_v38, %v2663_v6 }
 0x15f   : > { %1538 = vst [vmem:[%s2629_s22 + $0x28] sm:$0xff] %v1506_v39  ;;  %v1511_v12 = vmax.f32 %v1415_v43, 0.0  ;;  %v1407_v16 = vadd.f32 %v1406_v55, %v1246_v48  ;;  %v1128_v56 = vadd.f32 %v1840_v9, %v2601_v5  ;;  %v2815_v55 = vld [vmem:[#allocation18_spill] sm:$0xff]  ;;  %v1278_v6 = vadd.f32 %v1943_v20, %v1117_v19 }
 0x160   : > { %v2694_v57 = vpop.f32.mrf.mxu1  ;;  %v2028_v10 = vpop.f32.mrf.mxu0  ;;  %v1849_v8 = vadd.f32 %v2815_v55, %v2814_v59  ;;  %v1120_v38 = vadd.f32 %v1834_v40, %v2601_v5  ;;  %v2822_v40 = vld [vmem:[#allocation4_spill] sm:$0xff] }
 0x161   : > { %1543 = vst [vmem:[%s2629_s22 + $0x50] sm:$0xff] %v1511_v12  ;;  %v1509_v15 = vmax.f32 %v1407_v16, 0.0  ;;  %v1418_v11 = vadd.f32 %v2028_v10, %v1257_v4  ;;  %v1946_v4 = vadd.f32 %v2642_v13, %v2635_v44  ;;  %v2816_v10 = vld [vmem:[#allocation13_spill] sm:$0xff]  ;;  %v2818_v13 = vld [vmem:[#allocation19_spill] sm:$0xff] }
 0x162   : > { %v2701_v34 = vpop.f32.mrf.mxu1  ;;  %v1409_v54 = vpop.f32.mrf.mxu0  ;;  %v1141_v44 = vadd.f32 %v1849_v8, %v2601_v5 }
 0x163   : > { %1541 = vst [vmem:[%s2629_s22 + $0x40] sm:$0xff] %v1509_v15  ;;  %v1512_v18 = vmax.f32 %v1418_v11, 0.0  ;;  %v1410_v58 = vadd.f32 %v1409_v54, %v1249_v17  ;;  %v1843_v15 = vadd.f32 %v2817_v45, %v2816_v10  ;;  %v1958_v50 = vadd.f32 %v2701_v34, %v2694_v57 }
 0x164   : > { %v1959_v2 = vpop.f32.mrf.mxu1  ;;  %v2031_v62 = vpop.f32.mrf.mxu0 }
 0x165   : > { %1544 = vst [vmem:[%s2629_s22 + $0x58] sm:$0xff] %v1512_v18  ;;  %v1510_v22 = vmax.f32 %v1410_v58, 0.0  ;;  %v1431_v30 = vadd.f32 %v2031_v62, %v1270_v42  ;;  %v1289_v18 = vadd.f32 %v1952_v41, %v1128_v56  ;;  %v2819_v58 = vld [vmem:[#allocation20_spill] sm:$0xff]  ;;  %v1955_v62 = vadd.f32 %v2686_v23, %v2679_v49 }
 0x166   : > { %v1960_v1 = vpop.f32.mrf.mxu1  ;;  %v1422_v33 = vpop.f32.mrf.mxu0  ;;  %v1852_v42 = vadd.f32 %v2819_v58, %v2818_v13 }
 0x167   : > { %1542 = vst [vmem:[%s2629_s22 + $0x48] sm:$0xff] %v1510_v22  ;;  %v1515_v36 = vmax.f32 %v1431_v30, 0.0  ;;  %v1423_v47 = vadd.f32 %v1422_v33, %v1262_v63  ;;  %v1961_v52 = vadd.f32 %v1960_v1, %v1959_v2  ;;  %v1281_v2 = vadd.f32 %v1946_v4, %v1120_v38  ;;  %v2820_v63 = vld [vmem:[#allocation15_spill] sm:$0xff] }
 0x168   : > { %v1962_v46 = vpop.f32.mrf.mxu1  ;;  %v2032_v7 = vpop.f32.mrf.mxu0  ;;  %v1133_v30 = vadd.f32 %v1843_v15, %v2601_v5  ;;  %v1846_v51 = vadd.f32 %v2821_v35, %v2820_v63  ;;  %v1144_v49 = vadd.f32 %v1852_v42, %v2601_v5 }
 0x169   : > { %1547 = vst [vmem:[%s2629_s22 + $0x70] sm:$0xff] %v1515_v36  ;;  %v1513_v24 = vmax.f32 %v1423_v47, 0.0  ;;  %v1434_v28 = vadd.f32 %v2032_v7, %v1273_v29  ;;  %v1302_v29 = vadd.f32 %v1961_v52, %v1141_v44 }
 0x16a   : > { %v1963_v37 = vpop.f32.mrf.mxu1  ;;  %v1425_v39 = vpop.f32.mrf.mxu0  ;;  %v1294_v20 = vadd.f32 %v1955_v62, %v1133_v30  ;;  %v2826_v30 = vld [vmem:[#allocation6_spill] sm:$0xff] }
 0x16b   : > { %1545 = vst [vmem:[%s2629_s22 + $0x60] sm:$0xff] %v1513_v24  ;;  %v1516_v43 = vmax.f32 %v1434_v28, 0.0  ;;  %v1426_v48 = vadd.f32 %v1425_v39, %v1265_v61  ;;  %v1964_v32 = vadd.f32 %v1963_v37, %v1962_v46  ;;  %v1136_v24 = vadd.f32 %v1846_v51, %v2601_v5 }
 0x16c   : > { %v1965_v12 = vpop.f32.mrf.mxu1  ;;  %v2035_v16 = vpop.f32.mrf.mxu0  ;;  %v1157_v37 = vadd.f32 %v2822_v40, %v2601_v5  ;;  %v1165_v63 = vadd.f32 %v2826_v30, %v2601_v5  ;;  %v2829_v40 = vld [vmem:[#allocation9_spill] sm:$0xff] }
 0x16d   : > { %1548 = vst [vmem:[%s2629_s22 + $0x78] sm:$0xff] %v1516_v43  ;;  %v1514_v27 = vmax.f32 %v1426_v48, 0.0  ;;  %v1447_v31 = vadd.f32 %v2035_v16, %v1286_v26  ;;  %v1305_v25 = vadd.f32 %v1964_v32, %v1144_v49  ;;  %v1297_v48 = vadd.f32 %v1958_v50, %v1136_v24  ;;  %v2823_v26 = vld [vmem:[#allocation2_spill] sm:$0xff]  ;;  %v2828_v50 = vld [vmem:[#allocation8_spill] sm:$0xff] }
 0x16e   : > { %v1966_v11 = vpop.f32.mrf.mxu1  ;;  %v1438_v17 = vpop.f32.mrf.mxu0  ;;  %v1149_v56 = vadd.f32 %v2823_v26, %v2601_v5 }
 0x16f   : > { %1546 = vst [vmem:[%s2629_s22 + $0x68] sm:$0xff] %v1514_v27  ;;  %v1519_v54 = vmax.f32 %v1447_v31, 0.0  ;;  %v1439_v14 = vadd.f32 %v1438_v17, %v1278_v6  ;;  %v1967_v34 = vadd.f32 %v1966_v11, %v1965_v12  ;;  %v2824_v31 = vld [vmem:[#allocation5_spill] sm:$0xff] }
 0x170   : > { %v1968_v53 = vpop.f32.mrf.mxu1  ;;  %v2036_v60 = vpop.f32.mrf.mxu0  ;;  %v1160_v6 = vadd.f32 %v2824_v31, %v2601_v5 }
 0x171   : > { %1551 = vst [vmem:[%s2629_s22 + $0x90] sm:$0xff] %v1519_v54  ;;  %v1517_v0 = vmax.f32 %v1439_v14, 0.0  ;;  %v1450_v22 = vadd.f32 %v2036_v60, %v1289_v18  ;;  %v1310_v11 = vadd.f32 %v1967_v34, %v1149_v56  ;;  %v2825_v54 = vld [vmem:[#allocation3_spill] sm:$0xff] }
 0x172   : > { %v1969_v1 = vpop.f32.mrf.mxu1  ;;  %v1441_v33 = vpop.f32.mrf.mxu0  ;;  %v1152_v14 = vadd.f32 %v2825_v54, %v2601_v5 }
 0x173   : > { %1549 = vst [vmem:[%s2629_s22 + $0x80] sm:$0xff] %v1517_v0  ;;  %v1520_v36 = vmax.f32 %v1450_v22, 0.0  ;;  %v1442_v47 = vadd.f32 %v1441_v33, %v1281_v2  ;;  %v1970_v10 = vadd.f32 %v1969_v1, %v1968_v53 }
 0x174   : > { %v1971_v23 = vpop.f32.mrf.mxu1  ;;  %v2039_v3 = vpop.f32.mrf.mxu0 }
 0x175   : > { %1552 = vst [vmem:[%s2629_s22 + $0x98] sm:$0xff] %v1520_v36  ;;  %v1518_v9 = vmax.f32 %v1442_v47, 0.0  ;;  %v1463_v7 = vadd.f32 %v2039_v3, %v1302_v29  ;;  %v1313_v0 = vadd.f32 %v1970_v10, %v1152_v14 }
 0x176   : > { %v1972_v46 = vpop.f32.mrf.mxu1  ;;  %v1454_v28 = vpop.f32.mrf.mxu0 }
 0x177   : > { %1550 = vst [vmem:[%s2629_s22 + $0x88] sm:$0xff] %v1518_v9  ;;  %v1523_v61 = vmax.f32 %v1463_v7, 0.0  ;;  %v1973_v19 = vadd.f32 %v1972_v46, %v1971_v23  ;;  %v1455_v21 = vadd.f32 %v1454_v28, %v1294_v20  ;;  %v2827_v23 = vld [vmem:[#allocation7_spill] sm:$0xff]  ;;  %v1173_v9 = vadd.f32 %v2828_v50, %v2601_v5 }
 0x178   : > { %v1974_v39 = vpop.f32.mrf.mxu1  ;;  %v2040_v57 = vpop.f32.mrf.mxu0  ;;  %v1168_v3 = vadd.f32 %v2827_v23, %v2601_v5 }
 0x179   : > { %1555 = vst [vmem:[%s2629_s22 + $0xb0] sm:$0xff] %v1523_v61  ;;  %v1521_v41 = vmax.f32 %v1455_v21, 0.0  ;;  %v1466_v43 = vadd.f32 %v2040_v57, %v1305_v25  ;;  %v1318_v27 = vadd.f32 %v1973_v19, %v1157_v37  ;;  %v1176_v37 = vadd.f32 %v2829_v40, %v2601_v5 }
 0x17a   : > { %v1975_v59 = vpop.f32.mrf.mxu1  ;;  %v1457_v55 = vpop.f32.mrf.mxu0 }
 0x17b   : > { %1553 = vst [vmem:[%s2629_s22 + $0xa0] sm:$0xff] %v1521_v41  ;;  %v1524_v8 = vmax.f32 %v1466_v43, 0.0  ;;  %v1976_v16 = vadd.f32 %v1975_v59, %v1974_v39  ;;  %v1458_v4 = vadd.f32 %v1457_v55, %v1297_v48 }
 0x17c   : > { %v1977_v12 = vpop.f32.mrf.mxu1  ;;  %v2043_v38 = vpop.f32.mrf.mxu0 }
 0x17d   : > { %1556 = vst [vmem:[%s2629_s22 + $0xb8] sm:$0xff] %v1524_v8  ;;  %v1522_v45 = vmax.f32 %v1458_v4, 0.0  ;;  %v1479_v15 = vadd.f32 %v2043_v38, %v1318_v27  ;;  %v1321_v13 = vadd.f32 %v1976_v16, %v1160_v6 }
 0x17e   : > { %v1978_v17 = vpop.f32.mrf.mxu1  ;;  %v1470_v52 = vpop.f32.mrf.mxu0 }
 0x17f   : > { %1554 = vst [vmem:[%s2629_s22 + $0xa8] sm:$0xff] %v1522_v45  ;;  %v1527_v18 = vmax.f32 %v1479_v15, 0.0  ;;  %v1471_v44 = vadd.f32 %v1470_v52, %v1310_v11  ;;  %v1979_v60 = vadd.f32 %v1978_v17, %v1977_v12 }
 0x180   : > { %v1980_v58 = vpop.f32.mrf.mxu1  ;;  %v2044_v42 = vpop.f32.mrf.mxu0 }
 0x181   : > { %1559 = vst [vmem:[%s2629_s22 + $0xd0] sm:$0xff] %v1527_v18  ;;  %v1525_v53 = vmax.f32 %v1471_v44, 0.0  ;;  %v1482_v62 = vadd.f32 %v2044_v42, %v1321_v13  ;;  %v1326_v47 = vadd.f32 %v1979_v60, %v1165_v63 }
 0x182   : > { %v1981_v22 = vpop.f32.mrf.mxu1  ;;  %v1473_v2 = vpop.f32.mrf.mxu0 }
 0x183   : > { %1557 = vst [vmem:[%s2629_s22 + $0xc0] sm:$0xff] %v1525_v53  ;;  %v1528_v35 = vmax.f32 %v1482_v62, 0.0  ;;  %v1474_v51 = vadd.f32 %v1473_v2, %v1313_v0  ;;  %v1982_v32 = vadd.f32 %v1981_v22, %v1980_v58 }
 0x184   : > { %v1983_v1 = vpop.f32.mrf.mxu1  ;;  %v2047_v33 = vpop.f32.mrf.mxu0 }
 0x185   : > { %1560 = vst [vmem:[%s2629_s22 + $0xd8] sm:$0xff] %v1528_v35  ;;  %v1526_v36 = vmax.f32 %v1474_v51, 0.0  ;;  %v1329_v19 = vadd.f32 %v1982_v32, %v1168_v3 }
 0x186   : > { %v1984_v29 = vpop.f32.mrf.mxu1  ;;  %v1486_v49 = vpop.f32.mrf.mxu0 }
 0x187   : > { %1558 = vst [vmem:[%s2629_s22 + $0xc8] sm:$0xff] %v1526_v36  ;;  %v1985_v7 = vadd.f32 %v1984_v29, %v1983_v1  ;;  %v1487_v20 = vadd.f32 %v1486_v49, %v1326_v47 }
 0x188   : > { %v1986_v24 = vpop.f32.mrf.mxu1  ;;  %v2048_v46 = vpop.f32.mrf.mxu0 }
 0x189   : > { %v1334_v28 = vadd.f32 %v1985_v7, %v1173_v9  ;;  %v1529_v61 = vmax.f32 %v1487_v20, 0.0 }
 0x18a   : > { %v1987_v21 = vpop.f32.mrf.mxu1  ;;  %v1489_v25 = vpop.f32.mrf.mxu0 }
 0x18b   : > { %v1495_v39 = vadd.f32 %v2047_v33, %v1334_v28  ;;  %1561 = vst [vmem:[%s2629_s22 + $0xe0] sm:$0xff] %v1529_v61  ;;  %v1988_v57 = vadd.f32 %v1987_v21, %v1986_v24  ;;  %v1490_v34 = vadd.f32 %v1489_v25, %v1329_v19 }
 0x18d   : > { %v1531_v41 = vmax.f32 %v1495_v39, 0.0  ;;  %v1337_v43 = vadd.f32 %v1988_v57, %v1176_v37  ;;  %v1530_v48 = vmax.f32 %v1490_v34, 0.0 }
 0x18f   : > { %1563 = vst [vmem:[%s2629_s22 + $0xf0] sm:$0xff] %v1531_v41  ;;  %v1498_v26 = vadd.f32 %v2048_v46, %v1337_v43  ;;  %1562 = vst [vmem:[%s2629_s22 + $0xe8] sm:$0xff] %v1530_v48 }
 0x191   : > { %v1532_v56 = vmax.f32 %v1498_v26, 0.0 }
 0x193   : > { %1564 = vst [vmem:[%s2629_s22 + $0xf8] sm:$0xff] %v1532_v56 }
 0x194 PF: > { %s13_s12 = sadd.s32 1, %s2228_s12  }
 0x195   : > { %p10_p4 = scmp.ge.s32.totalorder %s13_s12, 4  }
 0x197   :  { %12 = sbr.rel (!%p10_p4) target bundleno = 1 (0x1), region = 62 }

</bundles_post_ra>
